<compile_context>
chip_gen: v7x
topology: tpu7x:2x2x1
jax: 0.10.0
libtpu: 0.0.40
codegen_flags: <defaults>
</compile_context>

<pallas_src>
import jax
import jax.numpy as jnp
from jax.experimental import pallas as pl
from jax.experimental.pallas import tpu as pltpu

EPS = 1e-5  # nn.BatchNorm1d default eps


def _decoder_kernel(p_ref, cpw_ref, cpb_ref,
                    g0_ref, b0_ref, w0_ref, fb0_ref,
                    g1_ref, b1_ref, w1_ref, fb1_ref,
                    gf_ref, bf_ref, ow_ref, ob_ref,
                    out_ref):
    B, _, H = gf_ref.shape          # gf_ref: (B, 1, H)
    BT, D = p_ref.shape
    T = BT // B
    n_blocks = g0_ref.shape[0]
    inv_n = 1.0 / BT

    def cbn_relu(x, gamma_b, beta_b, out_dtype):
        # x: (BT, H) f32; gamma_b/beta_b: (B, 1, H) per-batch affine params.
        # One traversal of x feeds both the sum and the sum-of-squares reduce,
        # then scale/shift are formed at tiny (B,1,H) size and applied as ONE
        # fused FMA -> ReLU -> cast pass over the activations.
        s1 = jnp.sum(x, axis=0, keepdims=True)                      # (1, H)
        s2 = jnp.sum(x * x, axis=0, keepdims=True)                  # (1, H)
        mean = s1 * inv_n
        # One-pass E[x^2]-E[x]^2 variance in f32, clamped at 0 (cancellation is
        # small for these ReLU-bounded activations; a tiled production variant
        # should switch to shifted / Welford accumulation).
        var = jnp.maximum(s2 * inv_n - mean * mean, 0.0)
        rinv = jax.lax.rsqrt(var + EPS).reshape(1, 1, H)
        m3 = mean.reshape(1, 1, H)
        scale = gamma_b * rinv                                      # (B, 1, H)
        shift = beta_b - m3 * scale                                 # (B, 1, H)
        y3 = x.reshape(B, T, H) * scale + shift                     # (B, T, H)
        return jnp.maximum(y3, 0.0).astype(out_dtype).reshape(BT, H)

    # conv_p (1x1 conv, K = dim = 3): broadcast FMAs on the VPU.  An MXU push
    # with only 3 of 128/256 K rows populated is pure latency; this also avoids
    # the wrapper-side pad + bf16 cast pass over p.
    p = p_ref[...]                                          # (BT, D) f32
    net = p[:, 0:1] * cpw_ref[0:1, :]
    for d in range(1, D):
        net = net + p[:, d:d + 1] * cpw_ref[d:d + 1, :]
    net = net + cpb_ref[...]                                # (BT, H) f32

    def block(i, net):
        h0 = cbn_relu(net, g0_ref[i], b0_ref[i], jnp.bfloat16)   # bf16 MXU operand
        h = jnp.dot(h0, w0_ref[i],
                    preferred_element_type=jnp.float32) + fb0_ref[i]
        h1 = cbn_relu(h, g1_ref[i], b1_ref[i], jnp.bfloat16)
        dx = jnp.dot(h1, w1_ref[i],
                     preferred_element_type=jnp.float32) + fb1_ref[i]
        return net + dx                  # identity shortcut (size_in == size_out)

    # Short fixed trip count: fully unroll for LLO scheduler visibility.
    net = jax.lax.fori_loop(0, n_blocks, block, net, unroll=True)

    # Final CBN -> ReLU -> conv_out as elementwise multiply + lane reduction,
    # written to a lane-dense (B, T) output (no (BT, 1) column, no N=1 matmul).
    # TODO(synk): if profiling shows the VPU binds on v6e/v7x, the per-channel
    #             column sums could be offloaded to the MXU via ones @ x.
    hf = cbn_relu(net, gf_ref[...], bf_ref[...], jnp.float32)       # (BT, H)
    prod = hf.reshape(B, T, H) * ow_ref[...].reshape(1, 1, H)
    out_ref[...] = jnp.sum(prod, axis=-1) + ob_ref[...]             # (B, T)


def precompute_conditioning(c, params):
    """Per-batch CBN gamma/beta (B rows each, not B*T).

    Hoists the conditioning matmuls out of the kernel entirely; the result is
    reusable across calls when c is fixed (pass it via decoder_cbatchnorm2's
    `cond=` argument to avoid recomputation).
    """
    c32 = jnp.asarray(c, jnp.float32)

    def per_block(gw, gb, bw, bb):
        gamma = jnp.einsum('bc,nch->nbh', c32, gw) + gb      # (n, B, H)
        beta = jnp.einsum('bc,nch->nbh', c32, bw) + bb
        return gamma[:, :, None, :], beta[:, :, None, :]     # (n, B, 1, H)

    def final(gw, gb, bw, bb):
        gamma = c32 @ gw + gb                                 # (B, H)
        beta = c32 @ bw + bb
        return gamma[:, None, :], beta[:, None, :]            # (B, 1, H)

    g0, b0 = per_block(params['bn0_gw'], params['bn0_gb'],
                       params['bn0_bw'], params['bn0_bb'])
    g1, b1 = per_block(params['bn1_gw'], params['bn1_gb'],
                       params['bn1_bw'], params['bn1_bb'])
    gf, bf_ = final(params['bnf_gw'], params['bnf_gb'],
                    params['bnf_bw'], params['bnf_bb'])
    return g0, b0, g1, b1, gf, bf_


def _vmem_capacity_bytes():
    """Physical per-TensorCore VMEM of the current generation (v7x-safe)."""
    try:
        return int(pltpu.get_tpu_info().vmem_capacity_bytes)
    except Exception:
        return 64 * 2 ** 20   # conservative fallback = v7x per-core capacity


def decoder_cbatchnorm2(p, c, params, n_blocks, cond=None):
    """p: (B, T, dim) query points, c: (B, c_dim) conditioning code."""
    B, T, D = p.shape
    H = params['conv_p_w'].shape[1]
    BT = B * T
    # TODO(synk): production-size B*T needs a (stage, row-tile) grid with a
    #             two-pass CBN per block: accumulate per-channel sum/sumsq into
    #             a small (2, H) scratch across ALL row tiles (batch statistics
    #             couple every row -- the reduction must stay global), keep the
    #             inter-pass residual stream in bf16 in HBM, and mark the row
    #             axis "parallel" (cross-core stats reduction via VMEM_SHARED)
    #             so v7x's second TensorCore is used.  This single-invocation
    #             kernel is sized for VMEM-resident BT only.
    assert T % 8 == 0, "T must be a multiple of 8 (f32 sublane tile) for this kernel"

    p32 = jnp.asarray(p, jnp.float32).reshape(BT, D)
    if cond is None:
        cond = precompute_conditioning(c, params)
    g0, b0, g1, b1, gf, bf_ = cond

    args = (p32, params['conv_p_w'], params['conv_p_b'],
            g0, b0, params['fc0_w_bf16'], params['fc0_b'],
            g1, b1, params['fc1_w_bf16'], params['fc1_b'],
            gf, bf_, params['out_w'].reshape(1, H), params['out_b'])

    in_bytes = sum(int(a.size) * a.dtype.itemsize for a in args)
    out_bytes = B * T * 4
    act_bytes = BT * H * 4
    # VMEM budget: inputs + output + a handful of live (BT, H) temporaries,
    # clamped below the physical per-core capacity of this generation minus
    # headroom (v7x: 64 MiB, v5e/v6e: 128 MiB).
    need = in_bytes + out_bytes + 16 * act_bytes + (4 << 20)
    vmem_limit = int(min(_vmem_capacity_bytes() - (8 << 20),
                         max(16 << 20, need)))

    n_cbn = 2 * n_blocks + 1
    cost = pl.CostEstimate(
        flops=int(2 * BT * (D * H + 2 * n_blocks * H * H + H)
                  + 10 * n_cbn * BT * H),
        transcendentals=int(n_cbn * H),
        bytes_accessed=int(in_bytes + out_bytes))

    out = pl.pallas_call(
        _decoder_kernel,
        out_shape=jax.ShapeDtypeStruct((B, T), jnp.float32),
        in_specs=[pl.BlockSpec(memory_space=pltpu.MemorySpace.VMEM)
                  for _ in args],
        out_specs=pl.BlockSpec(memory_space=pltpu.MemorySpace.VMEM),
        compiler_params=pltpu.CompilerParams(vmem_limit_bytes=vmem_limit),
        cost_estimate=cost,
    )(*args)

    return out   # (B, T) == out.squeeze(1) on the (B, 1, T) conv output


def init_params(key, dim, c_dim, hidden, n_blocks):
    """Deterministic synthetic parameters (shapes follow the PyTorch __init__)."""
    n_keys = 12 * n_blocks + 8
    keys = iter(jax.random.split(key, n_keys))

    def rnd(shape, scale=0.3):
        return scale * jax.random.normal(next(keys), shape, dtype=jnp.float32)

    def stack(shape, scale=0.3):
        return jnp.stack([rnd(shape, scale) for _ in range(n_blocks)])

    params = {
        # conv_p: Conv1d(dim, hidden, 1) -> weight stored as (dim, hidden)
        'conv_p_w': rnd((dim, hidden)),
        'conv_p_b': rnd((1, hidden)),
        # per-block CBatchNorm1d(c_dim, hidden) gamma/beta convs
        'bn0_gw': stack((c_dim, hidden)), 'bn0_gb': stack((1, hidden)),
        'bn0_bw': stack((c_dim, hidden)), 'bn0_bb': stack((1, hidden)),
        'fc0_w': stack((hidden, hidden)), 'fc0_b': stack((1, hidden)),
        'bn1_gw': stack((c_dim, hidden)), 'bn1_gb': stack((1, hidden)),
        'bn1_bw': stack((c_dim, hidden)), 'bn1_bb': stack((1, hidden)),
        'fc1_w': stack((hidden, hidden)), 'fc1_b': stack((1, hidden)),
        # final CBatchNorm1d
        'bnf_gw': rnd((c_dim, hidden)), 'bnf_gb': rnd((1, hidden)),
        'bnf_bw': rnd((c_dim, hidden)), 'bnf_bb': rnd((1, hidden)),
        # conv_out: Conv1d(hidden, 1, 1)
        'out_w': rnd((hidden, 1)),
        'out_b': rnd((1, 1)),
    }
    # MXU operands pre-cast ONCE here (not per call in the wrapper); the f32
    # masters are kept for the full-precision reference.
    params['fc0_w_bf16'] = params['fc0_w'].astype(jnp.bfloat16)
    params['fc1_w_bf16'] = params['fc1_w'].astype(jnp.bfloat16)
    return params


def reference(p, c, params, n_blocks, matmul_dtype=jnp.bfloat16):
    """Pure-JAX reference of the same forward pass.

    matmul_dtype controls the fc0/fc1 operand precision (bf16 mirrors the
    kernel's MXU operands; f32 is the exact forward).  conv_p and conv_out are
    f32 in both the kernel (VPU FMAs / lane reduce) and this reference.
    """
    B, T, D = p.shape
    x = p.reshape(B * T, D).astype(jnp.float32)
    cb = jnp.repeat(c.astype(jnp.float32), T, axis=0)

    def mm(a, w):
        return jnp.dot(a.astype(matmul_dtype), w.astype(matmul_dtype),
                       preferred_element_type=jnp.float32)

    def cbn(v, gw, gb, bw, bb):
        gamma = cb @ gw + gb
        beta = cb @ bw + bb
        mean = v.mean(0, keepdims=True)
        var = jnp.square(v - mean).mean(0, keepdims=True)   # biased var
        return gamma * (v - mean) * jax.lax.rsqrt(var + EPS) + beta

    net = x @ params['conv_p_w'] + params['conv_p_b']        # f32, like the kernel
    for i in range(n_blocks):
        h0 = jax.nn.relu(cbn(net, params['bn0_gw'][i], params['bn0_gb'][i],
                             params['bn0_bw'][i], params['bn0_bb'][i]))
        h = mm(h0, params['fc0_w'][i]) + params['fc0_b'][i]
        h1 = jax.nn.relu(cbn(h, params['bn1_gw'][i], params['bn1_gb'][i],
                             params['bn1_bw'][i], params['bn1_bb'][i]))
        dx = mm(h1, params['fc1_w'][i]) + params['fc1_b'][i]
        net = net + dx
    hf = jax.nn.relu(cbn(net, params['bnf_gw'], params['bnf_gb'],
                         params['bnf_bw'], params['bnf_bb']))
    out = hf @ params['out_w'] + params['out_b']             # final dot stays f32
    return out.reshape(B, T)


if __name__ == "__main__":
    B, T = 2, 8
    dim, c_dim, hidden, n_blocks = 3, 16, 128, 3   # lane-dense hidden (multiple of 128)

    key = jax.random.PRNGKey(0)
    kp, kc, kw = jax.random.split(key, 3)
    p = jax.random.normal(kp, (B, T, dim), dtype=jnp.float32)   # query points
    c = jax.random.normal(kc, (B, c_dim), dtype=jnp.float32)    # conditioning code
    params = init_params(kw, dim, c_dim, hidden, n_blocks)

    fwd = jax.jit(lambda p_, c_: decoder_cbatchnorm2(p_, c_, params, n_blocks))
    out = jax.block_until_ready(fwd(p, c))
    assert out.shape == (B, T), out.shape
    assert bool(jnp.all(jnp.isfinite(out)))

    # Tight check against a reference that mirrors the kernel's bf16 MXU operands.
    ref_bf16 = reference(p, c, params, n_blocks, matmul_dtype=jnp.bfloat16)
    assert jnp.allclose(out, ref_bf16, atol=5e-3, rtol=5e-3), (out, ref_bf16)

    # Loose structural check against the exact f32 forward pass.
    ref_f32 = reference(p, c, params, n_blocks, matmul_dtype=jnp.float32)
    assert jnp.allclose(out, ref_f32, atol=1e-1, rtol=1e-1), (out, ref_f32)

    print("KERNEL_OK")
</pallas_src>

<mosaic_0001>
module attributes {stable_mosaic.version = 11 : i64} {
  func.func @_decoder_kernel(%arg0: memref<16x3xf32, #tpu.memory_space<vmem>>, %arg1: memref<3x128xf32, #tpu.memory_space<vmem>>, %arg2: memref<1x128xf32, #tpu.memory_space<vmem>>, %arg3: memref<3x2x1x128xf32, #tpu.memory_space<vmem>>, %arg4: memref<3x2x1x128xf32, #tpu.memory_space<vmem>>, %arg5: memref<3x128x128xbf16, #tpu.memory_space<vmem>>, %arg6: memref<3x1x128xf32, #tpu.memory_space<vmem>>, %arg7: memref<3x2x1x128xf32, #tpu.memory_space<vmem>>, %arg8: memref<3x2x1x128xf32, #tpu.memory_space<vmem>>, %arg9: memref<3x128x128xbf16, #tpu.memory_space<vmem>>, %arg10: memref<3x1x128xf32, #tpu.memory_space<vmem>>, %arg11: memref<2x1x128xf32, #tpu.memory_space<vmem>>, %arg12: memref<2x1x128xf32, #tpu.memory_space<vmem>>, %arg13: memref<1x128xf32, #tpu.memory_space<vmem>>, %arg14: memref<1x1xf32, #tpu.memory_space<vmem>>, %arg15: memref<2x8xf32, #tpu.memory_space<vmem>>) attributes {dimension_semantics = [], scalar_prefetch = 0 : i64, scratch_operands = 0 : i64, tpu.core_type = #tpu.core_type<tc>} {
    %c0 = arith.constant 0 : index
    %c0_0 = arith.constant 0 : index
    %0 = vector.load %arg0[%c0, %c0_0] : memref<16x3xf32, #tpu.memory_space<vmem>>, vector<16x3xf32>
    %1 = vector.extract_strided_slice %0 {offsets = [0, 0], sizes = [16, 1], strides = [1, 1]} : vector<16x3xf32> to vector<16x1xf32>
    %c0_1 = arith.constant 0 : index
    %c0_2 = arith.constant 0 : index
    %2 = vector.load %arg1[%c0_1, %c0_2] : memref<3x128xf32, #tpu.memory_space<vmem>>, vector<1x128xf32>
    %3 = vector.broadcast %1 : vector<16x1xf32> to vector<16x128xf32>
    %4 = vector.broadcast %2 : vector<1x128xf32> to vector<16x128xf32>
    %5 = arith.mulf %3, %4 : vector<16x128xf32>
    %6 = vector.extract_strided_slice %0 {offsets = [0, 1], sizes = [16, 1], strides = [1, 1]} : vector<16x3xf32> to vector<16x1xf32>
    %c1 = arith.constant 1 : index
    %c0_3 = arith.constant 0 : index
    %7 = vector.load %arg1[%c1, %c0_3] : memref<3x128xf32, #tpu.memory_space<vmem>>, vector<1x128xf32>
    %8 = vector.broadcast %6 : vector<16x1xf32> to vector<16x128xf32>
    %9 = vector.broadcast %7 : vector<1x128xf32> to vector<16x128xf32>
    %10 = arith.mulf %8, %9 : vector<16x128xf32>
    %11 = arith.addf %5, %10 : vector<16x128xf32>
    %12 = vector.extract_strided_slice %0 {offsets = [0, 2], sizes = [16, 1], strides = [1, 1]} : vector<16x3xf32> to vector<16x1xf32>
    %c2 = arith.constant 2 : index
    %c0_4 = arith.constant 0 : index
    %13 = vector.load %arg1[%c2, %c0_4] : memref<3x128xf32, #tpu.memory_space<vmem>>, vector<1x128xf32>
    %14 = vector.broadcast %12 : vector<16x1xf32> to vector<16x128xf32>
    %15 = vector.broadcast %13 : vector<1x128xf32> to vector<16x128xf32>
    %16 = arith.mulf %14, %15 : vector<16x128xf32>
    %17 = arith.addf %11, %16 : vector<16x128xf32>
    %c0_5 = arith.constant 0 : index
    %c0_6 = arith.constant 0 : index
    %18 = vector.load %arg2[%c0_5, %c0_6] : memref<1x128xf32, #tpu.memory_space<vmem>>, vector<1x128xf32>
    %19 = vector.broadcast %18 : vector<1x128xf32> to vector<16x128xf32>
    %20 = arith.addf %17, %19 : vector<16x128xf32>
    %c0_i32 = arith.constant 0 : i32
    %21 = arith.index_cast %c0_i32 : i32 to index
    %c0_7 = arith.constant 0 : index
    %c0_8 = arith.constant 0 : index
    %c0_9 = arith.constant 0 : index
    %22 = vector.load %arg3[%21, %c0_7, %c0_8, %c0_9] : memref<3x2x1x128xf32, #tpu.memory_space<vmem>>, vector<1x2x1x128xf32>
    %23 = vector.shape_cast %22 : vector<1x2x1x128xf32> to vector<2x1x128xf32>
    %24 = arith.index_cast %c0_i32 : i32 to index
    %c0_10 = arith.constant 0 : index
    %c0_11 = arith.constant 0 : index
    %c0_12 = arith.constant 0 : index
    %25 = vector.load %arg4[%24, %c0_10, %c0_11, %c0_12] : memref<3x2x1x128xf32, #tpu.memory_space<vmem>>, vector<1x2x1x128xf32>
    %26 = vector.shape_cast %25 : vector<1x2x1x128xf32> to vector<2x1x128xf32>
    %cst = arith.constant dense<0.000000e+00> : vector<128xf32>
    %27 = vector.multi_reduction <add>, %20, %cst [0] : vector<16x128xf32> to vector<128xf32>
    %28 = vector.shape_cast %27 : vector<128xf32> to vector<1x128xf32>
    %29 = arith.mulf %20, %20 : vector<16x128xf32>
    %cst_13 = arith.constant dense<0.000000e+00> : vector<128xf32>
    %30 = vector.multi_reduction <add>, %29, %cst_13 [0] : vector<16x128xf32> to vector<128xf32>
    %31 = vector.shape_cast %30 : vector<128xf32> to vector<1x128xf32>
    %cst_14 = arith.constant 6.250000e-02 : f32
    %32 = vector.broadcast %cst_14 : f32 to vector<1x128xf32>
    %33 = arith.mulf %28, %32 : vector<1x128xf32>
    %cst_15 = arith.constant 6.250000e-02 : f32
    %34 = vector.broadcast %cst_15 : f32 to vector<1x128xf32>
    %35 = arith.mulf %31, %34 : vector<1x128xf32>
    %36 = arith.mulf %33, %33 : vector<1x128xf32>
    %37 = arith.subf %35, %36 : vector<1x128xf32>
    %cst_16 = arith.constant 0.000000e+00 : f32
    %38 = vector.broadcast %cst_16 : f32 to vector<1x128xf32>
    %39 = arith.maximumf %37, %38 : vector<1x128xf32>
    %cst_17 = arith.constant 9.99999974E-6 : f32
    %40 = vector.broadcast %cst_17 : f32 to vector<1x128xf32>
    %41 = arith.addf %39, %40 : vector<1x128xf32>
    %42 = math.rsqrt %41 : vector<1x128xf32>
    %43 = vector.shape_cast %42 : vector<1x128xf32> to vector<1x1x128xf32>
    %44 = vector.shape_cast %33 : vector<1x128xf32> to vector<1x1x128xf32>
    %45 = vector.broadcast %43 : vector<1x1x128xf32> to vector<2x1x128xf32>
    %46 = arith.mulf %23, %45 : vector<2x1x128xf32>
    %47 = vector.broadcast %44 : vector<1x1x128xf32> to vector<2x1x128xf32>
    %48 = arith.mulf %47, %46 : vector<2x1x128xf32>
    %49 = arith.subf %26, %48 : vector<2x1x128xf32>
    %50 = vector.shape_cast %20 : vector<16x128xf32> to vector<2x8x128xf32>
    %51 = vector.broadcast %46 : vector<2x1x128xf32> to vector<2x8x128xf32>
    %52 = arith.mulf %50, %51 : vector<2x8x128xf32>
    %53 = vector.broadcast %49 : vector<2x1x128xf32> to vector<2x8x128xf32>
    %54 = arith.addf %52, %53 : vector<2x8x128xf32>
    %cst_18 = arith.constant 0.000000e+00 : f32
    %55 = vector.broadcast %cst_18 : f32 to vector<2x8x128xf32>
    %56 = arith.maximumf %54, %55 : vector<2x8x128xf32>
    %57 = arith.truncf %56 : vector<2x8x128xf32> to vector<2x8x128xbf16>
    %58 = vector.shape_cast %57 : vector<2x8x128xbf16> to vector<16x128xbf16>
    %59 = arith.index_cast %c0_i32 : i32 to index
    %c0_19 = arith.constant 0 : index
    %c0_20 = arith.constant 0 : index
    %60 = vector.load %arg5[%59, %c0_19, %c0_20] : memref<3x128x128xbf16, #tpu.memory_space<vmem>>, vector<1x128x128xbf16>
    %61 = vector.shape_cast %60 : vector<1x128x128xbf16> to vector<128x128xbf16>
    %cst_21 = arith.constant dense<0.000000e+00> : vector<16x128xf32>
    %62 = tpu.matmul %58, %61, %cst_21 {dimension_numbers = #tpu.dot_dimension_numbers<[1], [0], [0], [1], [0, 0, 1, 1], [], []>} : vector<16x128xbf16>, vector<128x128xbf16>, vector<16x128xf32> -> vector<16x128xf32>
    %63 = arith.index_cast %c0_i32 : i32 to index
    %c0_22 = arith.constant 0 : index
    %c0_23 = arith.constant 0 : index
    %64 = vector.load %arg6[%63, %c0_22, %c0_23] : memref<3x1x128xf32, #tpu.memory_space<vmem>>, vector<1x1x128xf32>
    %65 = vector.shape_cast %64 : vector<1x1x128xf32> to vector<1x128xf32>
    %66 = vector.broadcast %65 : vector<1x128xf32> to vector<16x128xf32>
    %67 = arith.addf %62, %66 : vector<16x128xf32>
    %68 = arith.index_cast %c0_i32 : i32 to index
    %c0_24 = arith.constant 0 : index
    %c0_25 = arith.constant 0 : index
    %c0_26 = arith.constant 0 : index
    %69 = vector.load %arg7[%68, %c0_24, %c0_25, %c0_26] : memref<3x2x1x128xf32, #tpu.memory_space<vmem>>, vector<1x2x1x128xf32>
    %70 = vector.shape_cast %69 : vector<1x2x1x128xf32> to vector<2x1x128xf32>
    %71 = arith.index_cast %c0_i32 : i32 to index
    %c0_27 = arith.constant 0 : index
    %c0_28 = arith.constant 0 : index
    %c0_29 = arith.constant 0 : index
    %72 = vector.load %arg8[%71, %c0_27, %c0_28, %c0_29] : memref<3x2x1x128xf32, #tpu.memory_space<vmem>>, vector<1x2x1x128xf32>
    %73 = vector.shape_cast %72 : vector<1x2x1x128xf32> to vector<2x1x128xf32>
    %cst_30 = arith.constant dense<0.000000e+00> : vector<128xf32>
    %74 = vector.multi_reduction <add>, %67, %cst_30 [0] : vector<16x128xf32> to vector<128xf32>
    %75 = vector.shape_cast %74 : vector<128xf32> to vector<1x128xf32>
    %76 = arith.mulf %67, %67 : vector<16x128xf32>
    %cst_31 = arith.constant dense<0.000000e+00> : vector<128xf32>
    %77 = vector.multi_reduction <add>, %76, %cst_31 [0] : vector<16x128xf32> to vector<128xf32>
    %78 = vector.shape_cast %77 : vector<128xf32> to vector<1x128xf32>
    %cst_32 = arith.constant 6.250000e-02 : f32
    %79 = vector.broadcast %cst_32 : f32 to vector<1x128xf32>
    %80 = arith.mulf %75, %79 : vector<1x128xf32>
    %cst_33 = arith.constant 6.250000e-02 : f32
    %81 = vector.broadcast %cst_33 : f32 to vector<1x128xf32>
    %82 = arith.mulf %78, %81 : vector<1x128xf32>
    %83 = arith.mulf %80, %80 : vector<1x128xf32>
    %84 = arith.subf %82, %83 : vector<1x128xf32>
    %cst_34 = arith.constant 0.000000e+00 : f32
    %85 = vector.broadcast %cst_34 : f32 to vector<1x128xf32>
    %86 = arith.maximumf %84, %85 : vector<1x128xf32>
    %cst_35 = arith.constant 9.99999974E-6 : f32
    %87 = vector.broadcast %cst_35 : f32 to vector<1x128xf32>
    %88 = arith.addf %86, %87 : vector<1x128xf32>
    %89 = math.rsqrt %88 : vector<1x128xf32>
    %90 = vector.shape_cast %89 : vector<1x128xf32> to vector<1x1x128xf32>
    %91 = vector.shape_cast %80 : vector<1x128xf32> to vector<1x1x128xf32>
    %92 = vector.broadcast %90 : vector<1x1x128xf32> to vector<2x1x128xf32>
    %93 = arith.mulf %70, %92 : vector<2x1x128xf32>
    %94 = vector.broadcast %91 : vector<1x1x128xf32> to vector<2x1x128xf32>
    %95 = arith.mulf %94, %93 : vector<2x1x128xf32>
    %96 = arith.subf %73, %95 : vector<2x1x128xf32>
    %97 = vector.shape_cast %67 : vector<16x128xf32> to vector<2x8x128xf32>
    %98 = vector.broadcast %93 : vector<2x1x128xf32> to vector<2x8x128xf32>
    %99 = arith.mulf %97, %98 : vector<2x8x128xf32>
    %100 = vector.broadcast %96 : vector<2x1x128xf32> to vector<2x8x128xf32>
    %101 = arith.addf %99, %100 : vector<2x8x128xf32>
    %cst_36 = arith.constant 0.000000e+00 : f32
    %102 = vector.broadcast %cst_36 : f32 to vector<2x8x128xf32>
    %103 = arith.maximumf %101, %102 : vector<2x8x128xf32>
    %104 = arith.truncf %103 : vector<2x8x128xf32> to vector<2x8x128xbf16>
    %105 = vector.shape_cast %104 : vector<2x8x128xbf16> to vector<16x128xbf16>
    %106 = arith.index_cast %c0_i32 : i32 to index
    %c0_37 = arith.constant 0 : index
    %c0_38 = arith.constant 0 : index
    %107 = vector.load %arg9[%106, %c0_37, %c0_38] : memref<3x128x128xbf16, #tpu.memory_space<vmem>>, vector<1x128x128xbf16>
    %108 = vector.shape_cast %107 : vector<1x128x128xbf16> to vector<128x128xbf16>
    %cst_39 = arith.constant dense<0.000000e+00> : vector<16x128xf32>
    %109 = tpu.matmul %105, %108, %cst_39 {dimension_numbers = #tpu.dot_dimension_numbers<[1], [0], [0], [1], [0, 0, 1, 1], [], []>} : vector<16x128xbf16>, vector<128x128xbf16>, vector<16x128xf32> -> vector<16x128xf32>
    %110 = arith.index_cast %c0_i32 : i32 to index
    %c0_40 = arith.constant 0 : index
    %c0_41 = arith.constant 0 : index
    %111 = vector.load %arg10[%110, %c0_40, %c0_41] : memref<3x1x128xf32, #tpu.memory_space<vmem>>, vector<1x1x128xf32>
    %112 = vector.shape_cast %111 : vector<1x1x128xf32> to vector<1x128xf32>
    %113 = vector.broadcast %112 : vector<1x128xf32> to vector<16x128xf32>
    %114 = arith.addf %109, %113 : vector<16x128xf32>
    %115 = arith.addf %20, %114 : vector<16x128xf32>
    %c1_i32 = arith.constant 1 : i32
    %116 = arith.index_cast %c1_i32 : i32 to index
    %c0_42 = arith.constant 0 : index
    %c0_43 = arith.constant 0 : index
    %c0_44 = arith.constant 0 : index
    %117 = vector.load %arg3[%116, %c0_42, %c0_43, %c0_44] : memref<3x2x1x128xf32, #tpu.memory_space<vmem>>, vector<1x2x1x128xf32>
    %118 = vector.shape_cast %117 : vector<1x2x1x128xf32> to vector<2x1x128xf32>
    %119 = arith.index_cast %c1_i32 : i32 to index
    %c0_45 = arith.constant 0 : index
    %c0_46 = arith.constant 0 : index
    %c0_47 = arith.constant 0 : index
    %120 = vector.load %arg4[%119, %c0_45, %c0_46, %c0_47] : memref<3x2x1x128xf32, #tpu.memory_space<vmem>>, vector<1x2x1x128xf32>
    %121 = vector.shape_cast %120 : vector<1x2x1x128xf32> to vector<2x1x128xf32>
    %cst_48 = arith.constant dense<0.000000e+00> : vector<128xf32>
    %122 = vector.multi_reduction <add>, %115, %cst_48 [0] : vector<16x128xf32> to vector<128xf32>
    %123 = vector.shape_cast %122 : vector<128xf32> to vector<1x128xf32>
    %124 = arith.mulf %115, %115 : vector<16x128xf32>
    %cst_49 = arith.constant dense<0.000000e+00> : vector<128xf32>
    %125 = vector.multi_reduction <add>, %124, %cst_49 [0] : vector<16x128xf32> to vector<128xf32>
    %126 = vector.shape_cast %125 : vector<128xf32> to vector<1x128xf32>
    %cst_50 = arith.constant 6.250000e-02 : f32
    %127 = vector.broadcast %cst_50 : f32 to vector<1x128xf32>
    %128 = arith.mulf %123, %127 : vector<1x128xf32>
    %cst_51 = arith.constant 6.250000e-02 : f32
    %129 = vector.broadcast %cst_51 : f32 to vector<1x128xf32>
    %130 = arith.mulf %126, %129 : vector<1x128xf32>
    %131 = arith.mulf %128, %128 : vector<1x128xf32>
    %132 = arith.subf %130, %131 : vector<1x128xf32>
    %cst_52 = arith.constant 0.000000e+00 : f32
    %133 = vector.broadcast %cst_52 : f32 to vector<1x128xf32>
    %134 = arith.maximumf %132, %133 : vector<1x128xf32>
    %cst_53 = arith.constant 9.99999974E-6 : f32
    %135 = vector.broadcast %cst_53 : f32 to vector<1x128xf32>
    %136 = arith.addf %134, %135 : vector<1x128xf32>
    %137 = math.rsqrt %136 : vector<1x128xf32>
    %138 = vector.shape_cast %137 : vector<1x128xf32> to vector<1x1x128xf32>
    %139 = vector.shape_cast %128 : vector<1x128xf32> to vector<1x1x128xf32>
    %140 = vector.broadcast %138 : vector<1x1x128xf32> to vector<2x1x128xf32>
    %141 = arith.mulf %118, %140 : vector<2x1x128xf32>
    %142 = vector.broadcast %139 : vector<1x1x128xf32> to vector<2x1x128xf32>
    %143 = arith.mulf %142, %141 : vector<2x1x128xf32>
    %144 = arith.subf %121, %143 : vector<2x1x128xf32>
    %145 = vector.shape_cast %115 : vector<16x128xf32> to vector<2x8x128xf32>
    %146 = vector.broadcast %141 : vector<2x1x128xf32> to vector<2x8x128xf32>
    %147 = arith.mulf %145, %146 : vector<2x8x128xf32>
    %148 = vector.broadcast %144 : vector<2x1x128xf32> to vector<2x8x128xf32>
    %149 = arith.addf %147, %148 : vector<2x8x128xf32>
    %cst_54 = arith.constant 0.000000e+00 : f32
    %150 = vector.broadcast %cst_54 : f32 to vector<2x8x128xf32>
    %151 = arith.maximumf %149, %150 : vector<2x8x128xf32>
    %152 = arith.truncf %151 : vector<2x8x128xf32> to vector<2x8x128xbf16>
    %153 = vector.shape_cast %152 : vector<2x8x128xbf16> to vector<16x128xbf16>
    %154 = arith.index_cast %c1_i32 : i32 to index
    %c0_55 = arith.constant 0 : index
    %c0_56 = arith.constant 0 : index
    %155 = vector.load %arg5[%154, %c0_55, %c0_56] : memref<3x128x128xbf16, #tpu.memory_space<vmem>>, vector<1x128x128xbf16>
    %156 = vector.shape_cast %155 : vector<1x128x128xbf16> to vector<128x128xbf16>
    %cst_57 = arith.constant dense<0.000000e+00> : vector<16x128xf32>
    %157 = tpu.matmul %153, %156, %cst_57 {dimension_numbers = #tpu.dot_dimension_numbers<[1], [0], [0], [1], [0, 0, 1, 1], [], []>} : vector<16x128xbf16>, vector<128x128xbf16>, vector<16x128xf32> -> vector<16x128xf32>
    %158 = arith.index_cast %c1_i32 : i32 to index
    %c0_58 = arith.constant 0 : index
    %c0_59 = arith.constant 0 : index
    %159 = vector.load %arg6[%158, %c0_58, %c0_59] : memref<3x1x128xf32, #tpu.memory_space<vmem>>, vector<1x1x128xf32>
    %160 = vector.shape_cast %159 : vector<1x1x128xf32> to vector<1x128xf32>
    %161 = vector.broadcast %160 : vector<1x128xf32> to vector<16x128xf32>
    %162 = arith.addf %157, %161 : vector<16x128xf32>
    %163 = arith.index_cast %c1_i32 : i32 to index
    %c0_60 = arith.constant 0 : index
    %c0_61 = arith.constant 0 : index
    %c0_62 = arith.constant 0 : index
    %164 = vector.load %arg7[%163, %c0_60, %c0_61, %c0_62] : memref<3x2x1x128xf32, #tpu.memory_space<vmem>>, vector<1x2x1x128xf32>
    %165 = vector.shape_cast %164 : vector<1x2x1x128xf32> to vector<2x1x128xf32>
    %166 = arith.index_cast %c1_i32 : i32 to index
    %c0_63 = arith.constant 0 : index
    %c0_64 = arith.constant 0 : index
    %c0_65 = arith.constant 0 : index
    %167 = vector.load %arg8[%166, %c0_63, %c0_64, %c0_65] : memref<3x2x1x128xf32, #tpu.memory_space<vmem>>, vector<1x2x1x128xf32>
    %168 = vector.shape_cast %167 : vector<1x2x1x128xf32> to vector<2x1x128xf32>
    %cst_66 = arith.constant dense<0.000000e+00> : vector<128xf32>
    %169 = vector.multi_reduction <add>, %162, %cst_66 [0] : vector<16x128xf32> to vector<128xf32>
    %170 = vector.shape_cast %169 : vector<128xf32> to vector<1x128xf32>
    %171 = arith.mulf %162, %162 : vector<16x128xf32>
    %cst_67 = arith.constant dense<0.000000e+00> : vector<128xf32>
    %172 = vector.multi_reduction <add>, %171, %cst_67 [0] : vector<16x128xf32> to vector<128xf32>
    %173 = vector.shape_cast %172 : vector<128xf32> to vector<1x128xf32>
    %cst_68 = arith.constant 6.250000e-02 : f32
    %174 = vector.broadcast %cst_68 : f32 to vector<1x128xf32>
    %175 = arith.mulf %170, %174 : vector<1x128xf32>
    %cst_69 = arith.constant 6.250000e-02 : f32
    %176 = vector.broadcast %cst_69 : f32 to vector<1x128xf32>
    %177 = arith.mulf %173, %176 : vector<1x128xf32>
    %178 = arith.mulf %175, %175 : vector<1x128xf32>
    %179 = arith.subf %177, %178 : vector<1x128xf32>
    %cst_70 = arith.constant 0.000000e+00 : f32
    %180 = vector.broadcast %cst_70 : f32 to vector<1x128xf32>
    %181 = arith.maximumf %179, %180 : vector<1x128xf32>
    %cst_71 = arith.constant 9.99999974E-6 : f32
    %182 = vector.broadcast %cst_71 : f32 to vector<1x128xf32>
    %183 = arith.addf %181, %182 : vector<1x128xf32>
    %184 = math.rsqrt %183 : vector<1x128xf32>
    %185 = vector.shape_cast %184 : vector<1x128xf32> to vector<1x1x128xf32>
    %186 = vector.shape_cast %175 : vector<1x128xf32> to vector<1x1x128xf32>
    %187 = vector.broadcast %185 : vector<1x1x128xf32> to vector<2x1x128xf32>
    %188 = arith.mulf %165, %187 : vector<2x1x128xf32>
    %189 = vector.broadcast %186 : vector<1x1x128xf32> to vector<2x1x128xf32>
    %190 = arith.mulf %189, %188 : vector<2x1x128xf32>
    %191 = arith.subf %168, %190 : vector<2x1x128xf32>
    %192 = vector.shape_cast %162 : vector<16x128xf32> to vector<2x8x128xf32>
    %193 = vector.broadcast %188 : vector<2x1x128xf32> to vector<2x8x128xf32>
    %194 = arith.mulf %192, %193 : vector<2x8x128xf32>
    %195 = vector.broadcast %191 : vector<2x1x128xf32> to vector<2x8x128xf32>
    %196 = arith.addf %194, %195 : vector<2x8x128xf32>
    %cst_72 = arith.constant 0.000000e+00 : f32
    %197 = vector.broadcast %cst_72 : f32 to vector<2x8x128xf32>
    %198 = arith.maximumf %196, %197 : vector<2x8x128xf32>
    %199 = arith.truncf %198 : vector<2x8x128xf32> to vector<2x8x128xbf16>
    %200 = vector.shape_cast %199 : vector<2x8x128xbf16> to vector<16x128xbf16>
    %201 = arith.index_cast %c1_i32 : i32 to index
    %c0_73 = arith.constant 0 : index
    %c0_74 = arith.constant 0 : index
    %202 = vector.load %arg9[%201, %c0_73, %c0_74] : memref<3x128x128xbf16, #tpu.memory_space<vmem>>, vector<1x128x128xbf16>
    %203 = vector.shape_cast %202 : vector<1x128x128xbf16> to vector<128x128xbf16>
    %cst_75 = arith.constant dense<0.000000e+00> : vector<16x128xf32>
    %204 = tpu.matmul %200, %203, %cst_75 {dimension_numbers = #tpu.dot_dimension_numbers<[1], [0], [0], [1], [0, 0, 1, 1], [], []>} : vector<16x128xbf16>, vector<128x128xbf16>, vector<16x128xf32> -> vector<16x128xf32>
    %205 = arith.index_cast %c1_i32 : i32 to index
    %c0_76 = arith.constant 0 : index
    %c0_77 = arith.constant 0 : index
    %206 = vector.load %arg10[%205, %c0_76, %c0_77] : memref<3x1x128xf32, #tpu.memory_space<vmem>>, vector<1x1x128xf32>
    %207 = vector.shape_cast %206 : vector<1x1x128xf32> to vector<1x128xf32>
    %208 = vector.broadcast %207 : vector<1x128xf32> to vector<16x128xf32>
    %209 = arith.addf %204, %208 : vector<16x128xf32>
    %210 = arith.addf %115, %209 : vector<16x128xf32>
    %c2_i32 = arith.constant 2 : i32
    %211 = arith.index_cast %c2_i32 : i32 to index
    %c0_78 = arith.constant 0 : index
    %c0_79 = arith.constant 0 : index
    %c0_80 = arith.constant 0 : index
    %212 = vector.load %arg3[%211, %c0_78, %c0_79, %c0_80] : memref<3x2x1x128xf32, #tpu.memory_space<vmem>>, vector<1x2x1x128xf32>
    %213 = vector.shape_cast %212 : vector<1x2x1x128xf32> to vector<2x1x128xf32>
    %214 = arith.index_cast %c2_i32 : i32 to index
    %c0_81 = arith.constant 0 : index
    %c0_82 = arith.constant 0 : index
    %c0_83 = arith.constant 0 : index
    %215 = vector.load %arg4[%214, %c0_81, %c0_82, %c0_83] : memref<3x2x1x128xf32, #tpu.memory_space<vmem>>, vector<1x2x1x128xf32>
    %216 = vector.shape_cast %215 : vector<1x2x1x128xf32> to vector<2x1x128xf32>
    %cst_84 = arith.constant dense<0.000000e+00> : vector<128xf32>
    %217 = vector.multi_reduction <add>, %210, %cst_84 [0] : vector<16x128xf32> to vector<128xf32>
    %218 = vector.shape_cast %217 : vector<128xf32> to vector<1x128xf32>
    %219 = arith.mulf %210, %210 : vector<16x128xf32>
    %cst_85 = arith.constant dense<0.000000e+00> : vector<128xf32>
    %220 = vector.multi_reduction <add>, %219, %cst_85 [0] : vector<16x128xf32> to vector<128xf32>
    %221 = vector.shape_cast %220 : vector<128xf32> to vector<1x128xf32>
    %cst_86 = arith.constant 6.250000e-02 : f32
    %222 = vector.broadcast %cst_86 : f32 to vector<1x128xf32>
    %223 = arith.mulf %218, %222 : vector<1x128xf32>
    %cst_87 = arith.constant 6.250000e-02 : f32
    %224 = vector.broadcast %cst_87 : f32 to vector<1x128xf32>
    %225 = arith.mulf %221, %224 : vector<1x128xf32>
    %226 = arith.mulf %223, %223 : vector<1x128xf32>
    %227 = arith.subf %225, %226 : vector<1x128xf32>
    %cst_88 = arith.constant 0.000000e+00 : f32
    %228 = vector.broadcast %cst_88 : f32 to vector<1x128xf32>
    %229 = arith.maximumf %227, %228 : vector<1x128xf32>
    %cst_89 = arith.constant 9.99999974E-6 : f32
    %230 = vector.broadcast %cst_89 : f32 to vector<1x128xf32>
    %231 = arith.addf %229, %230 : vector<1x128xf32>
    %232 = math.rsqrt %231 : vector<1x128xf32>
    %233 = vector.shape_cast %232 : vector<1x128xf32> to vector<1x1x128xf32>
    %234 = vector.shape_cast %223 : vector<1x128xf32> to vector<1x1x128xf32>
    %235 = vector.broadcast %233 : vector<1x1x128xf32> to vector<2x1x128xf32>
    %236 = arith.mulf %213, %235 : vector<2x1x128xf32>
    %237 = vector.broadcast %234 : vector<1x1x128xf32> to vector<2x1x128xf32>
    %238 = arith.mulf %237, %236 : vector<2x1x128xf32>
    %239 = arith.subf %216, %238 : vector<2x1x128xf32>
    %240 = vector.shape_cast %210 : vector<16x128xf32> to vector<2x8x128xf32>
    %241 = vector.broadcast %236 : vector<2x1x128xf32> to vector<2x8x128xf32>
    %242 = arith.mulf %240, %241 : vector<2x8x128xf32>
    %243 = vector.broadcast %239 : vector<2x1x128xf32> to vector<2x8x128xf32>
    %244 = arith.addf %242, %243 : vector<2x8x128xf32>
    %cst_90 = arith.constant 0.000000e+00 : f32
    %245 = vector.broadcast %cst_90 : f32 to vector<2x8x128xf32>
    %246 = arith.maximumf %244, %245 : vector<2x8x128xf32>
    %247 = arith.truncf %246 : vector<2x8x128xf32> to vector<2x8x128xbf16>
    %248 = vector.shape_cast %247 : vector<2x8x128xbf16> to vector<16x128xbf16>
    %249 = arith.index_cast %c2_i32 : i32 to index
    %c0_91 = arith.constant 0 : index
    %c0_92 = arith.constant 0 : index
    %250 = vector.load %arg5[%249, %c0_91, %c0_92] : memref<3x128x128xbf16, #tpu.memory_space<vmem>>, vector<1x128x128xbf16>
    %251 = vector.shape_cast %250 : vector<1x128x128xbf16> to vector<128x128xbf16>
    %cst_93 = arith.constant dense<0.000000e+00> : vector<16x128xf32>
    %252 = tpu.matmul %248, %251, %cst_93 {dimension_numbers = #tpu.dot_dimension_numbers<[1], [0], [0], [1], [0, 0, 1, 1], [], []>} : vector<16x128xbf16>, vector<128x128xbf16>, vector<16x128xf32> -> vector<16x128xf32>
    %253 = arith.index_cast %c2_i32 : i32 to index
    %c0_94 = arith.constant 0 : index
    %c0_95 = arith.constant 0 : index
    %254 = vector.load %arg6[%253, %c0_94, %c0_95] : memref<3x1x128xf32, #tpu.memory_space<vmem>>, vector<1x1x128xf32>
    %255 = vector.shape_cast %254 : vector<1x1x128xf32> to vector<1x128xf32>
    %256 = vector.broadcast %255 : vector<1x128xf32> to vector<16x128xf32>
    %257 = arith.addf %252, %256 : vector<16x128xf32>
    %258 = arith.index_cast %c2_i32 : i32 to index
    %c0_96 = arith.constant 0 : index
    %c0_97 = arith.constant 0 : index
    %c0_98 = arith.constant 0 : index
    %259 = vector.load %arg7[%258, %c0_96, %c0_97, %c0_98] : memref<3x2x1x128xf32, #tpu.memory_space<vmem>>, vector<1x2x1x128xf32>
    %260 = vector.shape_cast %259 : vector<1x2x1x128xf32> to vector<2x1x128xf32>
    %261 = arith.index_cast %c2_i32 : i32 to index
    %c0_99 = arith.constant 0 : index
    %c0_100 = arith.constant 0 : index
    %c0_101 = arith.constant 0 : index
    %262 = vector.load %arg8[%261, %c0_99, %c0_100, %c0_101] : memref<3x2x1x128xf32, #tpu.memory_space<vmem>>, vector<1x2x1x128xf32>
    %263 = vector.shape_cast %262 : vector<1x2x1x128xf32> to vector<2x1x128xf32>
    %cst_102 = arith.constant dense<0.000000e+00> : vector<128xf32>
    %264 = vector.multi_reduction <add>, %257, %cst_102 [0] : vector<16x128xf32> to vector<128xf32>
    %265 = vector.shape_cast %264 : vector<128xf32> to vector<1x128xf32>
    %266 = arith.mulf %257, %257 : vector<16x128xf32>
    %cst_103 = arith.constant dense<0.000000e+00> : vector<128xf32>
    %267 = vector.multi_reduction <add>, %266, %cst_103 [0] : vector<16x128xf32> to vector<128xf32>
    %268 = vector.shape_cast %267 : vector<128xf32> to vector<1x128xf32>
    %cst_104 = arith.constant 6.250000e-02 : f32
    %269 = vector.broadcast %cst_104 : f32 to vector<1x128xf32>
    %270 = arith.mulf %265, %269 : vector<1x128xf32>
    %cst_105 = arith.constant 6.250000e-02 : f32
    %271 = vector.broadcast %cst_105 : f32 to vector<1x128xf32>
    %272 = arith.mulf %268, %271 : vector<1x128xf32>
    %273 = arith.mulf %270, %270 : vector<1x128xf32>
    %274 = arith.subf %272, %273 : vector<1x128xf32>
    %cst_106 = arith.constant 0.000000e+00 : f32
    %275 = vector.broadcast %cst_106 : f32 to vector<1x128xf32>
    %276 = arith.maximumf %274, %275 : vector<1x128xf32>
    %cst_107 = arith.constant 9.99999974E-6 : f32
    %277 = vector.broadcast %cst_107 : f32 to vector<1x128xf32>
    %278 = arith.addf %276, %277 : vector<1x128xf32>
    %279 = math.rsqrt %278 : vector<1x128xf32>
    %280 = vector.shape_cast %279 : vector<1x128xf32> to vector<1x1x128xf32>
    %281 = vector.shape_cast %270 : vector<1x128xf32> to vector<1x1x128xf32>
    %282 = vector.broadcast %280 : vector<1x1x128xf32> to vector<2x1x128xf32>
    %283 = arith.mulf %260, %282 : vector<2x1x128xf32>
    %284 = vector.broadcast %281 : vector<1x1x128xf32> to vector<2x1x128xf32>
    %285 = arith.mulf %284, %283 : vector<2x1x128xf32>
    %286 = arith.subf %263, %285 : vector<2x1x128xf32>
    %287 = vector.shape_cast %257 : vector<16x128xf32> to vector<2x8x128xf32>
    %288 = vector.broadcast %283 : vector<2x1x128xf32> to vector<2x8x128xf32>
    %289 = arith.mulf %287, %288 : vector<2x8x128xf32>
    %290 = vector.broadcast %286 : vector<2x1x128xf32> to vector<2x8x128xf32>
    %291 = arith.addf %289, %290 : vector<2x8x128xf32>
    %cst_108 = arith.constant 0.000000e+00 : f32
    %292 = vector.broadcast %cst_108 : f32 to vector<2x8x128xf32>
    %293 = arith.maximumf %291, %292 : vector<2x8x128xf32>
    %294 = arith.truncf %293 : vector<2x8x128xf32> to vector<2x8x128xbf16>
    %295 = vector.shape_cast %294 : vector<2x8x128xbf16> to vector<16x128xbf16>
    %296 = arith.index_cast %c2_i32 : i32 to index
    %c0_109 = arith.constant 0 : index
    %c0_110 = arith.constant 0 : index
    %297 = vector.load %arg9[%296, %c0_109, %c0_110] : memref<3x128x128xbf16, #tpu.memory_space<vmem>>, vector<1x128x128xbf16>
    %298 = vector.shape_cast %297 : vector<1x128x128xbf16> to vector<128x128xbf16>
    %cst_111 = arith.constant dense<0.000000e+00> : vector<16x128xf32>
    %299 = tpu.matmul %295, %298, %cst_111 {dimension_numbers = #tpu.dot_dimension_numbers<[1], [0], [0], [1], [0, 0, 1, 1], [], []>} : vector<16x128xbf16>, vector<128x128xbf16>, vector<16x128xf32> -> vector<16x128xf32>
    %300 = arith.index_cast %c2_i32 : i32 to index
    %c0_112 = arith.constant 0 : index
    %c0_113 = arith.constant 0 : index
    %301 = vector.load %arg10[%300, %c0_112, %c0_113] : memref<3x1x128xf32, #tpu.memory_space<vmem>>, vector<1x1x128xf32>
    %302 = vector.shape_cast %301 : vector<1x1x128xf32> to vector<1x128xf32>
    %303 = vector.broadcast %302 : vector<1x128xf32> to vector<16x128xf32>
    %304 = arith.addf %299, %303 : vector<16x128xf32>
    %305 = arith.addf %210, %304 : vector<16x128xf32>
    %c3_i32 = arith.constant 3 : i32
    %c0_114 = arith.constant 0 : index
    %c0_115 = arith.constant 0 : index
    %c0_116 = arith.constant 0 : index
    %306 = vector.load %arg11[%c0_114, %c0_115, %c0_116] : memref<2x1x128xf32, #tpu.memory_space<vmem>>, vector<2x1x128xf32>
    %c0_117 = arith.constant 0 : index
    %c0_118 = arith.constant 0 : index
    %c0_119 = arith.constant 0 : index
    %307 = vector.load %arg12[%c0_117, %c0_118, %c0_119] : memref<2x1x128xf32, #tpu.memory_space<vmem>>, vector<2x1x128xf32>
    %cst_120 = arith.constant dense<0.000000e+00> : vector<128xf32>
    %308 = vector.multi_reduction <add>, %305, %cst_120 [0] : vector<16x128xf32> to vector<128xf32>
    %309 = vector.shape_cast %308 : vector<128xf32> to vector<1x128xf32>
    %310 = arith.mulf %305, %305 : vector<16x128xf32>
    %cst_121 = arith.constant dense<0.000000e+00> : vector<128xf32>
    %311 = vector.multi_reduction <add>, %310, %cst_121 [0] : vector<16x128xf32> to vector<128xf32>
    %312 = vector.shape_cast %311 : vector<128xf32> to vector<1x128xf32>
    %cst_122 = arith.constant 6.250000e-02 : f32
    %313 = vector.broadcast %cst_122 : f32 to vector<1x128xf32>
    %314 = arith.mulf %309, %313 : vector<1x128xf32>
    %cst_123 = arith.constant 6.250000e-02 : f32
    %315 = vector.broadcast %cst_123 : f32 to vector<1x128xf32>
    %316 = arith.mulf %312, %315 : vector<1x128xf32>
    %317 = arith.mulf %314, %314 : vector<1x128xf32>
    %318 = arith.subf %316, %317 : vector<1x128xf32>
    %cst_124 = arith.constant 0.000000e+00 : f32
    %319 = vector.broadcast %cst_124 : f32 to vector<1x128xf32>
    %320 = arith.maximumf %318, %319 : vector<1x128xf32>
    %cst_125 = arith.constant 9.99999974E-6 : f32
    %321 = vector.broadcast %cst_125 : f32 to vector<1x128xf32>
    %322 = arith.addf %320, %321 : vector<1x128xf32>
    %323 = math.rsqrt %322 : vector<1x128xf32>
    %324 = vector.shape_cast %323 : vector<1x128xf32> to vector<1x1x128xf32>
    %325 = vector.shape_cast %314 : vector<1x128xf32> to vector<1x1x128xf32>
    %326 = vector.broadcast %324 : vector<1x1x128xf32> to vector<2x1x128xf32>
    %327 = arith.mulf %306, %326 : vector<2x1x128xf32>
    %328 = vector.broadcast %325 : vector<1x1x128xf32> to vector<2x1x128xf32>
    %329 = arith.mulf %328, %327 : vector<2x1x128xf32>
    %330 = arith.subf %307, %329 : vector<2x1x128xf32>
    %331 = vector.shape_cast %305 : vector<16x128xf32> to vector<2x8x128xf32>
    %332 = vector.broadcast %327 : vector<2x1x128xf32> to vector<2x8x128xf32>
    %333 = arith.mulf %331, %332 : vector<2x8x128xf32>
    %334 = vector.broadcast %330 : vector<2x1x128xf32> to vector<2x8x128xf32>
    %335 = arith.addf %333, %334 : vector<2x8x128xf32>
    %cst_126 = arith.constant 0.000000e+00 : f32
    %336 = vector.broadcast %cst_126 : f32 to vector<2x8x128xf32>
    %337 = arith.maximumf %335, %336 : vector<2x8x128xf32>
    %338 = vector.shape_cast %337 : vector<2x8x128xf32> to vector<16x128xf32>
    %339 = vector.shape_cast %338 : vector<16x128xf32> to vector<2x8x128xf32>
    %c0_127 = arith.constant 0 : index
    %c0_128 = arith.constant 0 : index
    %340 = vector.load %arg13[%c0_127, %c0_128] : memref<1x128xf32, #tpu.memory_space<vmem>>, vector<1x128xf32>
    %341 = vector.shape_cast %340 : vector<1x128xf32> to vector<1x1x128xf32>
    %342 = vector.broadcast %341 : vector<1x1x128xf32> to vector<2x8x128xf32>
    %343 = arith.mulf %339, %342 : vector<2x8x128xf32>
    %cst_129 = arith.constant dense<0.000000e+00> : vector<2x8xf32>
    %344 = vector.multi_reduction <add>, %343, %cst_129 [2] : vector<2x8x128xf32> to vector<2x8xf32>
    %c0_130 = arith.constant 0 : index
    %c0_131 = arith.constant 0 : index
    %345 = vector.load %arg14[%c0_130, %c0_131] : memref<1x1xf32, #tpu.memory_space<vmem>>, vector<1x1xf32>
    %346 = vector.broadcast %345 : vector<1x1xf32> to vector<2x8xf32>
    %347 = arith.addf %344, %346 : vector<2x8xf32>
    %c0_132 = arith.constant 0 : index
    %c0_133 = arith.constant 0 : index
    %348 = vector.load %arg15[%c0_132, %c0_133] : memref<2x8xf32, #tpu.memory_space<vmem>>, vector<2x8xf32>
    tpu.vector_store %arg15[%c0_132, %c0_133], %347 {strides = array<i32>} : memref<2x8xf32, #tpu.memory_space<vmem>>, vector<2x8xf32>,
    return
  }
}

</mosaic_0001>

<bundles_post_ra>
// kernel: _lambda_.1
= control target key start
LH: loop header
LB: loop body
LE: loop exit
PB: predicated region body
PF: predicated region fallthrough
CT: control target
= control target key end

     0   :  { %s2241_s0 = inlined_call_operand.vmem [shape: f32[16,3], index: 0, kind: input, shape index: {}]   ;;  %s2242_s1 = inlined_call_operand.vmem [shape: f32[3,128], index: 1, kind: input, shape index: {}]   ;;  %s2243_s2 = inlined_call_operand.vmem [shape: f32[1,128], index: 2, kind: input, shape index: {}]   ;;  %s2244_s3 = inlined_call_operand.vmem [shape: f32[3,2,1,128], index: 3, kind: input, shape index: {}]   ;;  %s2245_s4 = inlined_call_operand.vmem [shape: f32[3,2,1,128], index: 4, kind: input, shape index: {}]   ;;  %s2246_s5 = inlined_call_operand.hbm [shape: bf16[3,128,128], index: 5, kind: input, shape index: {}]   ;;  %s2247_s6 = inlined_call_operand.vmem [shape: f32[3,1,128], index: 6, kind: input, shape index: {}]   ;;  %s2248_s7 = inlined_call_operand.vmem [shape: f32[3,2,1,128], index: 7, kind: input, shape index: {}]   ;;  %s2249_s8 = inlined_call_operand.vmem [shape: f32[3,2,1,128], index: 8, kind: input, shape index: {}]   ;;  %s2250_s9 = inlined_call_operand.vmem [shape: bf16[3,128,128], index: 9, kind: input, shape index: {}]   ;;  %s2251_s10 = inlined_call_operand.vmem [shape: f32[3,1,128], index: 10, kind: input, shape index: {}]   ;;  %s2252_s11 = inlined_call_operand.vmem [shape: f32[2,1,128], index: 11, kind: input, shape index: {}]   ;;  %s2253_s12 = inlined_call_operand.vmem [shape: f32[2,1,128], index: 12, kind: input, shape index: {}]   ;;  %s2254_s13 = inlined_call_operand.vmem [shape: f32[1,128], index: 13, kind: input, shape index: {}]   ;;  %s2255_s14 = inlined_call_operand.<no memory space> [shape: f32[1,1], index: 14, kind: input, shape index: {}]   ;;  %s2256_s15 = inlined_call_operand.hbm [shape: f32[2,8], index: 15, kind: output, shape index: {}]  }
   0x1   :  { %v20_v0 = vstv %s2255_s14 }
   0x2   :  { %21 = vst [vmem:[#allocation2] sm:$0x1] %v20_v0 }
   0x3   :  { %22 = vsyncpa [#allocation4], 0 }
   0x4   :  { %23 = vsyncpa [#allocation5], 0  ;;  %s1792_s20 = smov [#allocation3]   ;;  %s1744_s24 = scalar_lea.hbm %s2246_s5, 3072 }
   0x5   :  { %s39_s21 = sshll.u32 %s1792_s20, 4  ;;  %p1745_p0 = scmp.ne.s32.totalorder %s2246_s5, %s1744_s24  ;;  %s40_s21 = int_to_ptr.vmem [resolvable:$true] %s39_s21 }
   0x6   :  { %p1748_p1 = scmp.lt.u32.totalorder %s1744_s24, %s2246_s5 }
   0x8   :  { %p1750_p2 = pnand %p1748_p1, %p1745_p0 }
   0xa   :  { %1753 = shalt.err (!%p1750_p2)
}
   0xb   :  { %s1754_s14 = scalar_lea.vmem %s40_s21, 3072  ;;  %p1759_p4 = scmp.lt.s32.totalorder %s40_s21, %s40_s21 }
   0xc   :  { %p1755_p3 = scmp.ne.s32.totalorder %s40_s21, %s1754_s14  ;;  %p1760_p5 = scmp.lt.s32.totalorder %s1754_s14, %s1754_s14 }
   0xe   :  { %p1761_p6 = por %p1760_p5, %p1759_p4 }
  0x10   :  { %p1762_p7 = pnand %p1761_p6, %p1755_p3 }
  0x12   :  { %1765 = shalt.err (!%p1762_p7)
}
  0x13   :  { %s1793_s29 = smov 64   ;;  %s1794_s30 = smov 4  }
  0x14   :  { %45 = dma.hbm_to_vmem [thread:$0]  %s2246_s5, 3072, %s40_s21, [#allocation4], %s1793_s29, %s1793_s29, %s1794_s30  }
  0x15   :  { %1788 = dma.done.wait [#allocation4], 3072  }
  0x16   :  { %1789 = vsyncadd [#allocation4], 4294964224  ;;  %v1795_v1 = vmov 1   ;;  %v1796_v2 = vmov 0   ;;  %v68_v3 = vld [vmem:[%s2241_s0] sm:$0xff]  ;;  %v69_v4 = vld [vmem:[%s2241_s0 + $0x8] sm:$0xff]  ;;  %v165_v59 = vlaneseq }
  0x17   :  { %1678 = vset.pattern.permute.xlu1 %v1795_v1  ;;  %1677 = vset.pattern.permute.xlu0 %v1796_v2  ;;  %v1797_v5 = vmov 2   ;;  %v1682_v6 = vld [vmem:[#allocation3] sm:$0xff]   ;;  %v1798_v7 = vmov 0.0   ;;  %vm1799_vm0 = vmmov 0   ;;  %v1683_v8 = vld [vmem:[#allocation3 + $0x8] sm:$0xff]   ;;  %v1684_v9 = vld [vmem:[#allocation3 + $0x10] sm:$0xff]  }
  0x18   :  { %89 = vperm.xlu1 %1678, %v68_v3   ;;  %73 = vperm.xlu0 %1677, %v68_v3   ;;  %v1685_v10 = vld [vmem:[#allocation3 + $0x18] sm:$0xff]   ;;  %v1686_v11 = vld [vmem:[#allocation3 + $0x20] sm:$0xff]   ;;  %v1687_v12 = vld [vmem:[#allocation3 + $0x28] sm:$0xff]   ;;  %v1939_v60 = vshrl.u32 %v165_v59, 7  ;;  %vm1350_vm1 = vcmask 1041409   ;;  %vm1353_vm2 = vcmask 58368  }
  0x19   :  { %1548 = vmatprep.subr.bf16.mxu0 %v1798_v7  ;;  %1564 = vmatprep.mubr.msk.bf16.mxu0 %vm1799_vm0, %v1798_v7  ;;  %v1688_v13 = vld [vmem:[#allocation3 + $0x30] sm:$0xff]   ;;  %v1689_v14 = vld [vmem:[#allocation3 + $0x38] sm:$0xff]   ;;  %v1371_v17 = vld [vmem:[%s2242_s1 + $0x1] ss:$0 sm:$0xff] }
  0x1a   :  { %1549 = vmatpush3.bf16.msra.mxu0 %v1682_v6  ;;  %1568 = vmatprep.subr.bf16.mxu1 %v1798_v7  ;;  %v1370_v18 = vld [vmem:[%s2242_s1] ss:$0 sm:$0xff]  ;;  %v1372_v25 = vld [vmem:[%s2242_s1 + $0x2] ss:$0 sm:$0xff]  ;;  %v131_v62 = vld [vmem:[%s2244_s3 + $0x1] sm:$0x1] }
  0x1b   :  { %1550 = vmatprep.subr.bf16.mxu0 %v1798_v7  ;;  %1584 = vmatprep.mubr.msk.bf16.mxu1 %vm1799_vm0, %v1798_v7  ;;  %v1373_v32 = vld [vmem:[%s2243_s2] ss:$0 sm:$0xff]  ;;  %v1948_v63 = vsub.s32 0, %v1939_v60 }
  0x1c   :  { %93 = vperm.xlu1 %1678, %v69_v4   ;;  %78 = vperm.xlu0 %1677, %v69_v4   ;;  %v130_v61 = vld [vmem:[%s2244_s3] sm:$0x1] }
  0x1e   :  { %1551 = vmatpush3.bf16.msra.mxu0 %v1683_v8 }
  0x1f   :  { %1552 = vmatprep.subr.bf16.mxu0 %v1798_v7 }
  0x20   :  { %1680 = vset.pattern.permute.xlu1 %v1797_v5  ;;  %1679 = vset.pattern.permute.xlu0 %v1797_v5 }
  0x21   :  { %110 = vperm.xlu1 %1680, %v69_v4   ;;  %106 = vperm.xlu0 %1679, %v68_v3   ;;  %v132_v3 = vld [vmem:[%s2245_s4] sm:$0x1]  ;;  %v133_v4 = vld [vmem:[%s2245_s4 + $0x1] sm:$0x1] }
  0x22   :  { %1553 = vmatpush3.bf16.msra.mxu0 %v1684_v9 }
  0x23   :  { %1554 = vmatprep.subr.bf16.mxu0 %v1798_v7 }
  0x25   :  { %1681 = vset.pattern.permute.xlu0 %v1796_v2 }
  0x26   :  { %1555 = vmatpush3.bf16.msra.mxu0 %v1685_v10 }
  0x27   :  { %1556 = vmatprep.subr.bf16.mxu0 %v1798_v7 }
  0x2a   :  { %1557 = vmatpush3.bf16.msra.mxu0 %v1686_v11 }
  0x2b   :  { %1558 = vmatprep.subr.bf16.mxu0 %v1798_v7 }
  0x2e   :  { %1559 = vmatpush3.bf16.msra.mxu0 %v1687_v12 }
  0x2f   :  { %1560 = vmatprep.subr.bf16.mxu0 %v1798_v7 }
  0x32   :  { %1561 = vmatpush3.bf16.msra.mxu0 %v1688_v13 }
  0x33   :  { %1562 = vmatprep.subr.bf16.mxu0 %v1798_v7 }
  0x36   :  { %1563 = vmatpush3.bf16.msra.mxu0 %v1689_v14 }
  0x37   :  { %1588 = vmatprep.subr.bf16.mxu0 %v1798_v7 }
  0x97   :  { %v90_v15 = vpop.permute.xlu1 %89  ;;  %v74_v16 = vpop.permute.xlu0 %73 }
  0x98   :  { %v100_v21 = vmul.f32 %v1371_v17, %v90_v15  ;;  %v85_v22 = vmul.f32 %v1370_v18, %v74_v16 }
  0x9a   :  { %v102_v28 = vadd.f32 %v100_v21, %v85_v22  ;;  %v1690_v21 = vld [vmem:[%s2250_s9] sm:$0xff]   ;;  %v1691_v22 = vld [vmem:[%s2250_s9 + $0x8] sm:$0xff]  }
  0x9b   :  { %v94_v19 = vpop.permute.xlu1 %93  ;;  %v79_v20 = vpop.permute.xlu0 %78  ;;  %1569 = vmatpush3.bf16.msra.mxu1 %v1690_v21 }
  0x9c   :  { %v101_v23 = vmul.f32 %v1371_v17, %v94_v19  ;;  %v86_v24 = vmul.f32 %v1370_v18, %v79_v20  ;;  %1570 = vmatprep.subr.bf16.mxu1 %v1798_v7 }
  0x9e   :  { %v103_v29 = vadd.f32 %v101_v23, %v86_v24  ;;  %v1692_v23 = vld [vmem:[%s2250_s9 + $0x10] sm:$0xff]   ;;  %v1693_v24 = vld [vmem:[%s2250_s9 + $0x18] sm:$0xff]  }
  0x9f   :  { %1571 = vmatpush3.bf16.msra.mxu1 %v1691_v22  ;;  %v1698_v22 = vld [vmem:[#allocation3 + $0x40] sm:$0xff]  }
  0xa0   :  { %v111_v26 = vpop.permute.xlu1 %110  ;;  %v107_v27 = vpop.permute.xlu0 %106  ;;  %1572 = vmatprep.subr.bf16.mxu1 %v1798_v7 }
  0xa1   :  { %v118_v30 = vmul.f32 %v1372_v25, %v111_v26  ;;  %v117_v31 = vmul.f32 %v1372_v25, %v107_v27  ;;  %v1694_v25 = vld [vmem:[%s2250_s9 + $0x20] sm:$0xff]   ;;  %v1695_v26 = vld [vmem:[%s2250_s9 + $0x28] sm:$0xff]   ;;  %v1696_v27 = vld [vmem:[%s2250_s9 + $0x30] sm:$0xff]  }
  0xa3   :  { %v120_v33 = vadd.f32 %v118_v30, %v103_v29  ;;  %v119_v34 = vadd.f32 %v117_v31, %v102_v28  ;;  %1573 = vmatpush3.bf16.msra.mxu1 %v1692_v23  ;;  %v1697_v28 = vld [vmem:[%s2250_s9 + $0x38] sm:$0xff]   ;;  %v1374_v29 = vld [vmem:[%s2247_s6] ss:$0 sm:$0xff]  ;;  %v1699_v23 = vld [vmem:[#allocation3 + $0x48] sm:$0xff]  }
  0xa4   :  { %1574 = vmatprep.subr.bf16.mxu1 %v1798_v7 }
  0xa5   :  { %v1928_v35 = vadd.f32 %v1373_v32, %v120_v33  ;;  %v1930_v36 = vadd.f32 %v1373_v32, %v119_v34 }
  0xa7   :  { %v142_v37 = vmul.f32 %v1928_v35, %v1928_v35  ;;  %v134_v38 = vadd.f32 %v1928_v35, %v1930_v36  ;;  %v141_v39 = vmul.f32 %v1930_v36, %v1930_v36  ;;  %1575 = vmatpush3.bf16.msra.mxu1 %v1693_v24  ;;  %v1700_v24 = vld [vmem:[#allocation3 + $0x50] sm:$0xff]  }
  0xa8   :  { %1576 = vmatprep.subr.bf16.mxu1 %v1798_v7 }
  0xa9   :  { %v135_v40 = vrot.slane %v134_v38, 4  ;;  %v143_v41 = vadd.f32 %v142_v37, %v141_v39 }
  0xab   :  { %v136_v42 = vadd.f32 %v135_v40, %v134_v38  ;;  %v144_v43 = vrot.slane %v143_v41, 4  ;;  %1577 = vmatpush3.bf16.msra.mxu1 %v1694_v25  ;;  %v1701_v25 = vld [vmem:[#allocation3 + $0x58] sm:$0xff]  }
  0xac   :  { %1578 = vmatprep.subr.bf16.mxu1 %v1798_v7 }
  0xad   :  { %v137_v44 = vrot.slane %v136_v42, 2  ;;  %v145_v45 = vadd.f32 %v144_v43, %v143_v41 }
  0xaf   :  { %v138_v46 = vadd.f32 %v137_v44, %v136_v42  ;;  %v146_v47 = vrot.slane %v145_v45, 2  ;;  %1579 = vmatpush3.bf16.msra.mxu1 %v1695_v26  ;;  %v1702_v26 = vld [vmem:[#allocation3 + $0x60] sm:$0xff]  }
  0xb0   :  { %1580 = vmatprep.subr.bf16.mxu1 %v1798_v7 }
  0xb1   :  { %v139_v48 = vrot.slane %v138_v46, 1  ;;  %v147_v49 = vadd.f32 %v146_v47, %v145_v45 }
  0xb3   :  { %v148_v50 = vrot.slane %v147_v49, 1  ;;  %v140_v51 = vadd.f32 %v139_v48, %v138_v46  ;;  %1581 = vmatpush3.bf16.msra.mxu1 %v1696_v27  ;;  %v1703_v27 = vld [vmem:[#allocation3 + $0x68] sm:$0xff]  }
  0xb4   :  { %1582 = vmatprep.subr.bf16.mxu1 %v1798_v7 }
  0xb5   :  { %v149_v52 = vadd.f32 %v148_v50, %v147_v49  ;;  %v150_v53 = vmul.f32 0.0625, %v140_v51 }
  0xb7   :  { %v151_v54 = vmul.f32 0.0625, %v149_v52  ;;  %v152_v55 = vmul.f32 %v150_v53, %v150_v53  ;;  %1583 = vmatpush3.bf16.msra.mxu1 %v1697_v28  ;;  %v1704_v28 = vld [vmem:[#allocation3 + $0x70] sm:$0xff]  }
  0xb8   :  { %1608 = vmatprep.subr.bf16.mxu1 %v1798_v7 }
  0xb9   :  { %v153_v56 = vsub.f32 %v151_v54, %v152_v55 }
  0xbb   :  { %v154_v57 = vmax.f32 %v153_v56, 0.0 }
  0xbd   :  { %v155_v58 = vadd.f32 1e-05, %v154_v57 }
  0xbf   :  { %1730 = vrsqrt.f32 %v155_v58 }
  0xc9   :  { %v1731_v0 = vpop.eup %1730 }
  0xca   :  { %v157_v1 = vmul.f32 %v1731_v0, %v130_v61  ;;  %v158_v2 = vmul.f32 %v1731_v0, %v131_v62  ;;  %v314_v62 = vld [vmem:[%s2248_s7 + $0x1] sm:$0x1]  ;;  %v313_v0 = vld [vmem:[%s2248_s7] sm:$0x1] }
  0xcc   :  { %v159_v5 = vmul.f32 %v157_v1, %v150_v53  ;;  %v160_v6 = vmul.f32 %v158_v2, %v150_v53  ;;  %v168_v8 = vrot.slane %v157_v1, %v1948_v63  ;;  %v172_v9 = vrot.slane %v158_v2, %v1948_v63 }
  0xce   :  { %v161_v10 = vsub.f32 %v132_v3, %v159_v5  ;;  %v162_v11 = vsub.f32 %v133_v4, %v160_v6  ;;  %v175_v12 = vmul.f32 %v168_v8, %v1930_v36  ;;  %v176_v13 = vmul.f32 %v172_v9, %v1928_v35  ;;  %v315_v4 = vld [vmem:[%s2249_s8] sm:$0x1]  ;;  %v316_v5 = vld [vmem:[%s2249_s8 + $0x1] sm:$0x1] }
  0xd0   :  { %v182_v14 = vrot.slane %v161_v10, %v1948_v63  ;;  %v186_v15 = vrot.slane %v162_v11, %v1948_v63 }
  0xd2   :  { %v189_v16 = vadd.f32 %v182_v14, %v175_v12  ;;  %v190_v17 = vadd.f32 %v186_v15, %v176_v13 }
  0xd4   :  { %v191_v18 = vmax.f32 %v189_v16, 0.0  ;;  %v192_v19 = vmax.f32 %v190_v17, 0.0 }
  0xd6   :  { %v1488_v20 = vpack.c.bf16 %v192_v19, %v191_v18 }
  0xd8   :  { %1565 = vmatmul.mubr.bf16.vlgmr.msra.gmra.mrb[0].mxu0 %v1488_v20 }
  0xd9   :  { %1604 = vmatprep.mubr.msk.bf16.mxu0 %vm1799_vm0, %v1798_v7  ;;  %1589 = vmatpush3.bf16.msra.mxu0 %v1698_v22 }
  0xda   :  { %1590 = vmatprep.subr.bf16.mxu0 %v1798_v7 }
  0xdd   :  { %1591 = vmatpush3.bf16.msra.mxu0 %v1699_v23  ;;  %v1706_v23 = vld [vmem:[%s2250_s9 + $0x40] sm:$0xff]  }
  0xde   :  { %1592 = vmatprep.subr.bf16.mxu0 %v1798_v7 }
  0xe1   :  { %1593 = vmatpush3.bf16.msra.mxu0 %v1700_v24  ;;  %v1707_v24 = vld [vmem:[%s2250_s9 + $0x48] sm:$0xff]  }
  0xe2   :  { %1594 = vmatprep.subr.bf16.mxu0 %v1798_v7 }
  0xe5   :  { %1595 = vmatpush3.bf16.msra.mxu0 %v1701_v25  ;;  %v1708_v25 = vld [vmem:[%s2250_s9 + $0x50] sm:$0xff]  }
  0xe6   :  { %1596 = vmatprep.subr.bf16.mxu0 %v1798_v7 }
  0xe9   :  { %1597 = vmatpush3.bf16.msra.mxu0 %v1702_v26  ;;  %v1709_v26 = vld [vmem:[%s2250_s9 + $0x58] sm:$0xff]  }
  0xea   :  { %1598 = vmatprep.subr.bf16.mxu0 %v1798_v7 }
  0xed   :  { %1599 = vmatpush3.bf16.msra.mxu0 %v1703_v27  ;;  %v1710_v27 = vld [vmem:[%s2250_s9 + $0x60] sm:$0xff]  }
  0xee   :  { %1600 = vmatprep.subr.bf16.mxu0 %v1798_v7 }
  0xf1   :  { %1601 = vmatpush3.bf16.msra.mxu0 %v1704_v28  ;;  %v1711_v28 = vld [vmem:[%s2250_s9 + $0x68] sm:$0xff]  }
  0xf2   :  { %1602 = vmatprep.subr.bf16.mxu0 %v1798_v7 }
 0x1ab   :  { %v306_v30 = vpop.f32.mrb[0].mxu0 }
 0x1ac   :  { %v307_v31 = vadd.f32 %v1374_v29, %v306_v30  ;;  %v1566_v32 = vpop.f32.mrb[1].mxu0  ;;  %v1384_v30 = vld [vmem:[%s2251_s10] ss:$0 sm:$0xff] }
 0x1ad   :  { %v309_v33 = vpop.f32.mrb[2].mxu0 }
 0x1ae   :  { %v310_v34 = vadd.f32 %v1374_v29, %v309_v33  ;;  %v1567_v37 = vpop.f32.mrb[3].mxu0  ;;  %v324_v38 = vmul.f32 %v307_v31, %v307_v31  ;;  %v1705_v29 = vld [vmem:[#allocation3 + $0x78] sm:$0xff]  }
 0x1af   :  { %1603 = vmatpush3.bf16.msra.mxu0 %v1705_v29  ;;  %v1712_v29 = vld [vmem:[%s2250_s9 + $0x70] sm:$0xff]  }
 0x1b0   :  { %v317_v39 = vadd.f32 %v310_v34, %v307_v31  ;;  %v325_v40 = vmul.f32 %v310_v34, %v310_v34  ;;  %1628 = vmatprep.subr.bf16.mxu0 %v1798_v7 }
 0x1b2   :  { %v318_v41 = vrot.slane %v317_v39, 4  ;;  %v326_v42 = vadd.f32 %v325_v40, %v324_v38 }
 0x1b4   :  { %v319_v43 = vadd.f32 %v318_v41, %v317_v39  ;;  %v327_v44 = vrot.slane %v326_v42, 4 }
 0x1b6   :  { %v320_v45 = vrot.slane %v319_v43, 2  ;;  %v328_v46 = vadd.f32 %v327_v44, %v326_v42 }
 0x1b8   :  { %v321_v47 = vadd.f32 %v320_v45, %v319_v43  ;;  %v329_v48 = vrot.slane %v328_v46, 2 }
 0x1ba   :  { %v322_v49 = vrot.slane %v321_v47, 1  ;;  %v330_v50 = vadd.f32 %v329_v48, %v328_v46 }
 0x1bc   :  { %v323_v51 = vadd.f32 %v322_v49, %v321_v47  ;;  %v331_v52 = vrot.slane %v330_v50, 1 }
 0x1be   :  { %v332_v53 = vadd.f32 %v331_v52, %v330_v50  ;;  %v333_v54 = vmul.f32 0.0625, %v323_v51 }
 0x1c0   :  { %v334_v55 = vmul.f32 0.0625, %v332_v53  ;;  %v335_v56 = vmul.f32 %v333_v54, %v333_v54 }
 0x1c2   :  { %v336_v57 = vsub.f32 %v334_v55, %v335_v56 }
 0x1c4   :  { %v337_v58 = vmax.f32 %v336_v57, 0.0 }
 0x1c6   :  { %v338_v61 = vadd.f32 1e-05, %v337_v58 }
 0x1c8   :  { %1732 = vrsqrt.f32 %v338_v61 }
 0x1d2   :  { %v1733_v1 = vpop.eup %1732 }
 0x1d3   :  { %v341_v2 = vmul.f32 %v1733_v1, %v314_v62  ;;  %v340_v3 = vmul.f32 %v1733_v1, %v313_v0  ;;  %v1395_v0 = vld [vmem:[%s2244_s3 + $0x3] sm:$0x1]  ;;  %v1394_v1 = vld [vmem:[%s2244_s3 + $0x2] sm:$0x1] }
 0x1d5   :  { %v343_v6 = vmul.f32 %v341_v2, %v333_v54  ;;  %v355_v8 = vrot.slane %v341_v2, %v1948_v63  ;;  %v342_v9 = vmul.f32 %v340_v3, %v333_v54  ;;  %v351_v10 = vrot.slane %v340_v3, %v1948_v63 }
 0x1d7   :  { %v359_v11 = vmul.f32 %v355_v8, %v310_v34  ;;  %v344_v12 = vsub.f32 %v315_v4, %v342_v9  ;;  %v345_v13 = vsub.f32 %v316_v5, %v343_v6  ;;  %v358_v14 = vmul.f32 %v351_v10, %v307_v31  ;;  %v1396_v5 = vld [vmem:[%s2245_s4 + $0x2] sm:$0x1]  ;;  %v1397_v6 = vld [vmem:[%s2245_s4 + $0x3] sm:$0x1] }
 0x1d9   :  { %v365_v15 = vrot.slane %v344_v12, %v1948_v63  ;;  %v369_v16 = vrot.slane %v345_v13, %v1948_v63 }
 0x1db   :  { %v372_v17 = vadd.f32 %v365_v15, %v358_v14  ;;  %v373_v18 = vadd.f32 %v369_v16, %v359_v11 }
 0x1dd   :  { %v374_v19 = vmax.f32 %v372_v17, 0.0  ;;  %v375_v20 = vmax.f32 %v373_v18, 0.0 }
 0x1df   :  { %v1489_v21 = vpack.c.bf16 %v375_v20, %v374_v19 }
 0x1e1   :  { %1585 = vmatmul.mubr.bf16.vlgmr.msra.gmra.mrb[0].mxu1 %v1489_v21 }
 0x1e2   :  { %1624 = vmatprep.mubr.msk.bf16.mxu1 %vm1799_vm0, %v1798_v7  ;;  %1609 = vmatpush3.bf16.msra.mxu1 %v1706_v23 }
 0x1e3   :  { %1610 = vmatprep.subr.bf16.mxu1 %v1798_v7 }
 0x1e6   :  { %1611 = vmatpush3.bf16.msra.mxu1 %v1707_v24  ;;  %v1714_v24 = vld [vmem:[#allocation3 + $0x80] sm:$0xff]  }
 0x1e7   :  { %1612 = vmatprep.subr.bf16.mxu1 %v1798_v7 }
 0x1ea   :  { %1613 = vmatpush3.bf16.msra.mxu1 %v1708_v25  ;;  %v1715_v25 = vld [vmem:[#allocation3 + $0x88] sm:$0xff]  }
 0x1eb   :  { %1614 = vmatprep.subr.bf16.mxu1 %v1798_v7 }
 0x1ee   :  { %1615 = vmatpush3.bf16.msra.mxu1 %v1709_v26  ;;  %v1716_v26 = vld [vmem:[#allocation3 + $0x90] sm:$0xff]  }
 0x1ef   :  { %1616 = vmatprep.subr.bf16.mxu1 %v1798_v7 }
 0x1f2   :  { %1617 = vmatpush3.bf16.msra.mxu1 %v1710_v27  ;;  %v1717_v27 = vld [vmem:[#allocation3 + $0x98] sm:$0xff]  }
 0x1f3   :  { %1618 = vmatprep.subr.bf16.mxu1 %v1798_v7 }
 0x1f6   :  { %1619 = vmatpush3.bf16.msra.mxu1 %v1711_v28  ;;  %v1718_v28 = vld [vmem:[#allocation3 + $0xa0] sm:$0xff]  }
 0x1f7   :  { %1620 = vmatprep.subr.bf16.mxu1 %v1798_v7 }
 0x1fa   :  { %1621 = vmatpush3.bf16.msra.mxu1 %v1712_v29  ;;  %v1719_v29 = vld [vmem:[#allocation3 + $0xa8] sm:$0xff]  }
 0x1fb   :  { %1622 = vmatprep.subr.bf16.mxu1 %v1798_v7 }
 0x2b4   :  { %v489_v31 = vpop.f32.mrb[0].mxu1 }
 0x2b5   :  { %v490_v32 = vadd.f32 %v1384_v30, %v489_v31  ;;  %v1586_v33 = vpop.f32.mrb[1].mxu1  ;;  %v1399_v31 = vld [vmem:[%s2247_s6 + $0x1] ss:$0 sm:$0xff] }
 0x2b6   :  { %v492_v34 = vpop.f32.mrb[2].mxu1 }
 0x2b7   :  { %v2029_v37 = vadd.f32 %v490_v32, %v1930_v36  ;;  %v493_v38 = vadd.f32 %v1384_v30, %v492_v34  ;;  %v1587_v39 = vpop.f32.mrb[3].mxu1  ;;  %v1713_v30 = vld [vmem:[%s2250_s9 + $0x78] sm:$0xff]  }
 0x2b8   :  { %1623 = vmatpush3.bf16.msra.mxu1 %v1713_v30  ;;  %v1720_v30 = vld [vmem:[#allocation3 + $0xb0] sm:$0xff]  }
 0x2b9   :  { %v2032_v40 = vadd.f32 %v493_v38, %v1928_v35  ;;  %v511_v41 = vmul.f32 %v2029_v37, %v2029_v37  ;;  %1648 = vmatprep.subr.bf16.mxu1 %v1798_v7 }
 0x2bb   :  { %v504_v42 = vadd.f32 %v2032_v40, %v2029_v37  ;;  %v512_v43 = vmul.f32 %v2032_v40, %v2032_v40 }
 0x2bd   :  { %v505_v44 = vrot.slane %v504_v42, 4  ;;  %v513_v45 = vadd.f32 %v512_v43, %v511_v41 }
 0x2bf   :  { %v506_v46 = vadd.f32 %v505_v44, %v504_v42  ;;  %v514_v47 = vrot.slane %v513_v45, 4 }
 0x2c1   :  { %v507_v36 = vrot.slane %v506_v46, 2  ;;  %v515_v48 = vadd.f32 %v514_v47, %v513_v45 }
 0x2c3   :  { %v508_v49 = vadd.f32 %v507_v36, %v506_v46  ;;  %v516_v50 = vrot.slane %v515_v48, 2 }
 0x2c5   :  { %v509_v51 = vrot.slane %v508_v49, 1  ;;  %v517_v35 = vadd.f32 %v516_v50, %v515_v48 }
 0x2c7   :  { %v510_v52 = vadd.f32 %v509_v51, %v508_v49  ;;  %v518_v53 = vrot.slane %v517_v35, 1 }
 0x2c9   :  { %v519_v54 = vadd.f32 %v518_v53, %v517_v35  ;;  %v520_v55 = vmul.f32 0.0625, %v510_v52 }
 0x2cb   :  { %v521_v56 = vmul.f32 0.0625, %v519_v54  ;;  %v522_v57 = vmul.f32 %v520_v55, %v520_v55 }
 0x2cd   :  { %v523_v58 = vsub.f32 %v521_v56, %v522_v57 }
 0x2cf   :  { %v524_v61 = vmax.f32 %v523_v58, 0.0 }
 0x2d1   :  { %v525_v62 = vadd.f32 1e-05, %v524_v61 }
 0x2d3   :  { %1734 = vrsqrt.f32 %v525_v62 }
 0x2dd   :  { %v1735_v2 = vpop.eup %1734 }
 0x2de   :  { %v528_v3 = vmul.f32 %v1735_v2, %v1395_v0  ;;  %v527_v4 = vmul.f32 %v1735_v2, %v1394_v1  ;;  %v1410_v1 = vld [vmem:[%s2248_s7 + $0x3] sm:$0x1]  ;;  %v1409_v2 = vld [vmem:[%s2248_s7 + $0x2] sm:$0x1] }
 0x2e0   :  { %v542_v8 = vrot.slane %v528_v3, %v1948_v63  ;;  %v529_v9 = vmul.f32 %v527_v4, %v520_v55  ;;  %v530_v10 = vmul.f32 %v528_v3, %v520_v55  ;;  %v538_v11 = vrot.slane %v527_v4, %v1948_v63 }
 0x2e2   :  { %v531_v12 = vsub.f32 %v1396_v5, %v529_v9  ;;  %v532_v13 = vsub.f32 %v1397_v6, %v530_v10  ;;  %v546_v14 = vmul.f32 %v542_v8, %v2032_v40  ;;  %v545_v15 = vmul.f32 %v538_v11, %v2029_v37  ;;  %v1412_v6 = vld [vmem:[%s2249_s8 + $0x3] sm:$0x1]  ;;  %v1411_v8 = vld [vmem:[%s2249_s8 + $0x2] sm:$0x1] }
 0x2e4   :  { %v552_v16 = vrot.slane %v531_v12, %v1948_v63  ;;  %v556_v17 = vrot.slane %v532_v13, %v1948_v63 }
 0x2e6   :  { %v559_v18 = vadd.f32 %v552_v16, %v545_v15  ;;  %v560_v19 = vadd.f32 %v556_v17, %v546_v14 }
 0x2e8   :  { %v561_v20 = vmax.f32 %v559_v18, 0.0  ;;  %v562_v21 = vmax.f32 %v560_v19, 0.0 }
 0x2ea   :  { %v1490_v22 = vpack.c.bf16 %v562_v21, %v561_v20 }
 0x2ec   :  { %1605 = vmatmul.mubr.bf16.vlgmr.msra.gmra.mrb[4].mxu0 %v1490_v22 }
 0x2ed   :  { %1644 = vmatprep.mubr.msk.bf16.mxu0 %vm1799_vm0, %v1798_v7  ;;  %1629 = vmatpush3.bf16.msra.mxu0 %v1714_v24 }
 0x2ee   :  { %1630 = vmatprep.subr.bf16.mxu0 %v1798_v7 }
 0x2f1   :  { %1631 = vmatpush3.bf16.msra.mxu0 %v1715_v25  ;;  %v1722_v25 = vld [vmem:[%s2250_s9 + $0x80] sm:$0xff]  }
 0x2f2   :  { %1632 = vmatprep.subr.bf16.mxu0 %v1798_v7 }
 0x2f5   :  { %1633 = vmatpush3.bf16.msra.mxu0 %v1716_v26  ;;  %v1723_v26 = vld [vmem:[%s2250_s9 + $0x88] sm:$0xff]  }
 0x2f6   :  { %1634 = vmatprep.subr.bf16.mxu0 %v1798_v7 }
 0x2f9   :  { %1635 = vmatpush3.bf16.msra.mxu0 %v1717_v27  ;;  %v1724_v27 = vld [vmem:[%s2250_s9 + $0x90] sm:$0xff]  }
 0x2fa   :  { %1636 = vmatprep.subr.bf16.mxu0 %v1798_v7 }
 0x2fd   :  { %1637 = vmatpush3.bf16.msra.mxu0 %v1718_v28  ;;  %v1725_v28 = vld [vmem:[%s2250_s9 + $0x98] sm:$0xff]  }
 0x2fe   :  { %1638 = vmatprep.subr.bf16.mxu0 %v1798_v7 }
 0x301   :  { %1639 = vmatpush3.bf16.msra.mxu0 %v1719_v29  ;;  %v1726_v29 = vld [vmem:[%s2250_s9 + $0xa0] sm:$0xff]  }
 0x302   :  { %1640 = vmatprep.subr.bf16.mxu0 %v1798_v7 }
 0x305   :  { %1641 = vmatpush3.bf16.msra.mxu0 %v1720_v30  ;;  %v1727_v30 = vld [vmem:[%s2250_s9 + $0xa8] sm:$0xff]  }
 0x306   :  { %1642 = vmatprep.subr.bf16.mxu0 %v1798_v7 }
 0x3bf   :  { %v678_v32 = vpop.f32.mrb[4].mxu0 }
 0x3c0   :  { %v679_v33 = vadd.f32 %v1399_v31, %v678_v32  ;;  %v1606_v34 = vpop.f32.mrb[5].mxu0  ;;  %v1430_v32 = vld [vmem:[%s2251_s10 + $0x1] ss:$0 sm:$0xff] }
 0x3c1   :  { %v681_v38 = vpop.f32.mrb[6].mxu0 }
 0x3c2   :  { %v682_v39 = vadd.f32 %v1399_v31, %v681_v38  ;;  %v1607_v41 = vpop.f32.mrb[7].mxu0  ;;  %v698_v42 = vmul.f32 %v679_v33, %v679_v33  ;;  %v1721_v31 = vld [vmem:[#allocation3 + $0xb8] sm:$0xff]  }
 0x3c3   :  { %1643 = vmatpush3.bf16.msra.mxu0 %v1721_v31  ;;  %v1728_v31 = vld [vmem:[%s2250_s9 + $0xb0] sm:$0xff]  }
 0x3c4   :  { %v691_v43 = vadd.f32 %v682_v39, %v679_v33  ;;  %v699_v44 = vmul.f32 %v682_v39, %v682_v39 }
 0x3c6   :  { %v692_v45 = vrot.slane %v691_v43, 4  ;;  %v700_v46 = vadd.f32 %v699_v44, %v698_v42 }
 0x3c8   :  { %v693_v47 = vadd.f32 %v692_v45, %v691_v43  ;;  %v701_v36 = vrot.slane %v700_v46, 4 }
 0x3ca   :  { %v694_v48 = vrot.slane %v693_v47, 2  ;;  %v702_v49 = vadd.f32 %v701_v36, %v700_v46 }
 0x3cc   :  { %v695_v50 = vadd.f32 %v694_v48, %v693_v47  ;;  %v703_v51 = vrot.slane %v702_v49, 2 }
 0x3ce   :  { %v696_v35 = vrot.slane %v695_v50, 1  ;;  %v704_v52 = vadd.f32 %v703_v51, %v702_v49 }
 0x3d0   :  { %v697_v53 = vadd.f32 %v696_v35, %v695_v50  ;;  %v705_v54 = vrot.slane %v704_v52, 1 }
 0x3d2   :  { %v706_v55 = vadd.f32 %v705_v54, %v704_v52  ;;  %v707_v56 = vmul.f32 0.0625, %v697_v53 }
 0x3d4   :  { %v708_v57 = vmul.f32 0.0625, %v706_v55  ;;  %v709_v58 = vmul.f32 %v707_v56, %v707_v56 }
 0x3d6   :  { %v710_v61 = vsub.f32 %v708_v57, %v709_v58 }
 0x3d8   :  { %v711_v62 = vmax.f32 %v710_v61, 0.0 }
 0x3da   :  { %v712_v0 = vadd.f32 1e-05, %v711_v62 }
 0x3dc   :  { %1736 = vrsqrt.f32 %v712_v0 }
 0x3e6   :  { %v1737_v3 = vpop.eup %1736 }
 0x3e7   :  { %v715_v4 = vmul.f32 %v1737_v3, %v1410_v1  ;;  %v714_v5 = vmul.f32 %v1737_v3, %v1409_v2  ;;  %v1441_v2 = vld [vmem:[%s2244_s3 + $0x5] sm:$0x1]  ;;  %v1440_v3 = vld [vmem:[%s2244_s3 + $0x4] sm:$0x1] }
 0x3e9   :  { %v717_v9 = vmul.f32 %v715_v4, %v707_v56  ;;  %v729_v10 = vrot.slane %v715_v4, %v1948_v63  ;;  %v716_v11 = vmul.f32 %v714_v5, %v707_v56  ;;  %v725_v12 = vrot.slane %v714_v5, %v1948_v63 }
 0x3eb   :  { %v719_v13 = vsub.f32 %v1412_v6, %v717_v9  ;;  %v733_v14 = vmul.f32 %v729_v10, %v682_v39  ;;  %v718_v15 = vsub.f32 %v1411_v8, %v716_v11  ;;  %v732_v16 = vmul.f32 %v725_v12, %v679_v33  ;;  %v1442_v8 = vld [vmem:[%s2245_s4 + $0x4] sm:$0x1]  ;;  %v1443_v9 = vld [vmem:[%s2245_s4 + $0x5] sm:$0x1] }
 0x3ed   :  { %v743_v17 = vrot.slane %v719_v13, %v1948_v63  ;;  %v739_v18 = vrot.slane %v718_v15, %v1948_v63 }
 0x3ef   :  { %v747_v19 = vadd.f32 %v743_v17, %v733_v14  ;;  %v746_v20 = vadd.f32 %v739_v18, %v732_v16 }
 0x3f1   :  { %v749_v21 = vmax.f32 %v747_v19, 0.0  ;;  %v748_v22 = vmax.f32 %v746_v20, 0.0 }
 0x3f3   :  { %v1491_v23 = vpack.c.bf16 %v749_v21, %v748_v22 }
 0x3f5   :  { %1625 = vmatmul.mubr.bf16.vlgmr.msra.gmra.mrb[4].mxu1 %v1491_v23 }
 0x3f6   :  { %1664 = vmatprep.mubr.msk.bf16.mxu1 %vm1799_vm0, %v1798_v7  ;;  %1649 = vmatpush3.bf16.msra.mxu1 %v1722_v25  ;;  %v1476_v25 = vld [vmem:[%s2251_s10 + $0x2] ss:$0 sm:$0xff] }
 0x3f7   :  { %1650 = vmatprep.subr.bf16.mxu1 %v1798_v7 }
 0x3fa   :  { %1651 = vmatpush3.bf16.msra.mxu1 %v1723_v26 }
 0x3fb   :  { %1652 = vmatprep.subr.bf16.mxu1 %v1798_v7 }
 0x3fe   :  { %1653 = vmatpush3.bf16.msra.mxu1 %v1724_v27 }
 0x3ff   :  { %1654 = vmatprep.subr.bf16.mxu1 %v1798_v7 }
 0x402   :  { %1655 = vmatpush3.bf16.msra.mxu1 %v1725_v28 }
 0x403   :  { %1656 = vmatprep.subr.bf16.mxu1 %v1798_v7 }
 0x406   :  { %1657 = vmatpush3.bf16.msra.mxu1 %v1726_v29 }
 0x407   :  { %1658 = vmatprep.subr.bf16.mxu1 %v1798_v7 }
 0x40a   :  { %1659 = vmatpush3.bf16.msra.mxu1 %v1727_v30 }
 0x40b   :  { %1660 = vmatprep.subr.bf16.mxu1 %v1798_v7 }
 0x40e   :  { %1661 = vmatpush3.bf16.msra.mxu1 %v1728_v31 }
 0x40f   :  { %1662 = vmatprep.subr.bf16.mxu1 %v1798_v7 }
 0x4c8   :  { %v865_v33 = vpop.f32.mrb[4].mxu1 }
 0x4c9   :  { %v866_v34 = vadd.f32 %v1430_v32, %v865_v33  ;;  %v1626_v38 = vpop.f32.mrb[5].mxu1  ;;  %v1445_v33 = vld [vmem:[%s2247_s6 + $0x2] ss:$0 sm:$0xff] }
 0x4ca   :  { %v868_v39 = vpop.f32.mrb[6].mxu1 }
 0x4cb   :  { %v2124_v41 = vadd.f32 %v866_v34, %v2029_v37  ;;  %v869_v42 = vadd.f32 %v1430_v32, %v868_v39  ;;  %v1627_v43 = vpop.f32.mrb[7].mxu1  ;;  %v1729_v32 = vld [vmem:[%s2250_s9 + $0xb8] sm:$0xff]  }
 0x4cc   :  { %1663 = vmatpush3.bf16.msra.mxu1 %v1729_v32 }
 0x4cd   :  { %v2127_v44 = vadd.f32 %v869_v42, %v2032_v40  ;;  %v887_v45 = vmul.f32 %v2124_v41, %v2124_v41 }
 0x4cf   :  { %v880_v46 = vadd.f32 %v2127_v44, %v2124_v41  ;;  %v888_v47 = vmul.f32 %v2127_v44, %v2127_v44 }
 0x4d1   :  { %v881_v36 = vrot.slane %v880_v46, 4  ;;  %v889_v48 = vadd.f32 %v888_v47, %v887_v45 }
 0x4d3   :  { %v882_v49 = vadd.f32 %v881_v36, %v880_v46  ;;  %v890_v50 = vrot.slane %v889_v48, 4 }
 0x4d5   :  { %v883_v37 = vrot.slane %v882_v49, 2  ;;  %v891_v51 = vadd.f32 %v890_v50, %v889_v48 }
 0x4d7   :  { %v884_v35 = vadd.f32 %v883_v37, %v882_v49  ;;  %v892_v52 = vrot.slane %v891_v51, 2 }
 0x4d9   :  { %v885_v53 = vrot.slane %v884_v35, 1  ;;  %v893_v40 = vadd.f32 %v892_v52, %v891_v51 }
 0x4db   :  { %v886_v54 = vadd.f32 %v885_v53, %v884_v35  ;;  %v894_v55 = vrot.slane %v893_v40, 1 }
 0x4dd   :  { %v895_v56 = vadd.f32 %v894_v55, %v893_v40  ;;  %v896_v57 = vmul.f32 0.0625, %v886_v54 }
 0x4df   :  { %v897_v58 = vmul.f32 0.0625, %v895_v56  ;;  %v898_v61 = vmul.f32 %v896_v57, %v896_v57 }
 0x4e1   :  { %v899_v62 = vsub.f32 %v897_v58, %v898_v61 }
 0x4e3   :  { %v900_v0 = vmax.f32 %v899_v62, 0.0 }
 0x4e5   :  { %v901_v1 = vadd.f32 1e-05, %v900_v0 }
 0x4e7   :  { %1738 = vrsqrt.f32 %v901_v1 }
 0x4f1   :  { %v1739_v4 = vpop.eup %1738 }
 0x4f2   :  { %v904_v5 = vmul.f32 %v1739_v4, %v1441_v2  ;;  %v903_v6 = vmul.f32 %v1739_v4, %v1440_v3  ;;  %v1456_v2 = vld [vmem:[%s2248_s7 + $0x5] sm:$0x1]  ;;  %v1455_v3 = vld [vmem:[%s2248_s7 + $0x4] sm:$0x1] }
 0x4f4   :  { %v918_v10 = vrot.slane %v904_v5, %v1948_v63  ;;  %v905_v11 = vmul.f32 %v903_v6, %v896_v57  ;;  %v906_v12 = vmul.f32 %v904_v5, %v896_v57  ;;  %v914_v13 = vrot.slane %v903_v6, %v1948_v63 }
 0x4f6   :  { %v907_v14 = vsub.f32 %v1442_v8, %v905_v11  ;;  %v908_v15 = vsub.f32 %v1443_v9, %v906_v12  ;;  %v922_v16 = vmul.f32 %v918_v10, %v2127_v44  ;;  %v921_v17 = vmul.f32 %v914_v13, %v2124_v41  ;;  %v1458_v8 = vld [vmem:[%s2249_s8 + $0x5] sm:$0x1]  ;;  %v1457_v9 = vld [vmem:[%s2249_s8 + $0x4] sm:$0x1] }
 0x4f8   :  { %v928_v18 = vrot.slane %v907_v14, %v1948_v63  ;;  %v932_v19 = vrot.slane %v908_v15, %v1948_v63 }
 0x4fa   :  { %v935_v20 = vadd.f32 %v928_v18, %v921_v17  ;;  %v936_v21 = vadd.f32 %v932_v19, %v922_v16 }
 0x4fc   :  { %v937_v22 = vmax.f32 %v935_v20, 0.0  ;;  %v938_v23 = vmax.f32 %v936_v21, 0.0 }
 0x4fe   :  { %v1492_v24 = vpack.c.bf16 %v938_v23, %v937_v22 }
 0x500   :  { %1645 = vmatmul.mubr.bf16.vlgmr.msra.gmra.mrb[8].mxu0 %v1492_v24 }
 0x5d3   :  { %v1054_v34 = vpop.f32.mrb[8].mxu0 }
 0x5d4   :  { %v1055_v38 = vadd.f32 %v1445_v33, %v1054_v34  ;;  %v1646_v39 = vpop.f32.mrb[9].mxu0 }
 0x5d5   :  { %v1057_v42 = vpop.f32.mrb[10].mxu0 }
 0x5d6   :  { %v1058_v43 = vadd.f32 %v1445_v33, %v1057_v42  ;;  %v1647_v45 = vpop.f32.mrb[11].mxu0  ;;  %v1074_v46 = vmul.f32 %v1055_v38, %v1055_v38 }
 0x5d8   :  { %v1067_v47 = vadd.f32 %v1058_v43, %v1055_v38  ;;  %v1075_v36 = vmul.f32 %v1058_v43, %v1058_v43 }
 0x5da   :  { %v1068_v48 = vrot.slane %v1067_v47, 4  ;;  %v1076_v7 = vadd.f32 %v1075_v36, %v1074_v46 }
 0x5dc   :  { %v1069_v49 = vadd.f32 %v1068_v48, %v1067_v47  ;;  %v1077_v50 = vrot.slane %v1076_v7, 4 }
 0x5de   :  { %v1070_v37 = vrot.slane %v1069_v49, 2  ;;  %v1078_v51 = vadd.f32 %v1077_v50, %v1076_v7 }
 0x5e0   :  { %v1071_v35 = vadd.f32 %v1070_v37, %v1069_v49  ;;  %v1079_v52 = vrot.slane %v1078_v51, 2 }
 0x5e2   :  { %v1072_v53 = vrot.slane %v1071_v35, 1  ;;  %v1080_v40 = vadd.f32 %v1079_v52, %v1078_v51 }
 0x5e4   :  { %v1073_v54 = vadd.f32 %v1072_v53, %v1071_v35  ;;  %v1081_v55 = vrot.slane %v1080_v40, 1 }
 0x5e6   :  { %v1082_v56 = vadd.f32 %v1081_v55, %v1080_v40  ;;  %v1083_v57 = vmul.f32 0.0625, %v1073_v54  ;;  %v1251_v55 = vld [vmem:[%s2252_s11 + $0x1] sm:$0x1] }
 0x5e8   :  { %v1084_v58 = vmul.f32 0.0625, %v1082_v56  ;;  %v1085_v61 = vmul.f32 %v1083_v57, %v1083_v57  ;;  %v1250_v56 = vld [vmem:[%s2252_s11] sm:$0x1] }
 0x5ea   :  { %v1086_v62 = vsub.f32 %v1084_v58, %v1085_v61 }
 0x5ec   :  { %v1087_v0 = vmax.f32 %v1086_v62, 0.0  ;;  %v1253_v62 = vld [vmem:[%s2253_s12 + $0x1] sm:$0x1] }
 0x5ee   :  { %v1088_v1 = vadd.f32 1e-05, %v1087_v0  ;;  %v1252_v0 = vld [vmem:[%s2253_s12] sm:$0x1]  ;;  %s1800_s12 = smov [#allocation6]  }
 0x5ef   :  { %s1361_s18 = sshll.u32 %s1800_s12, 4  ;;  %s1362_s18 = int_to_ptr.vmem [resolvable:$true] %s1361_s18 }
 0x5f0   :  { %1740 = vrsqrt.f32 %v1088_v1  ;;  %p1771_p9 = scmp.lt.s32.totalorder %s1362_s18, %s1362_s18 }
 0x5fa   :  { %v1741_v4 = vpop.eup %1740 }
 0x5fb   :  { %v1091_v5 = vmul.f32 %v1741_v4, %v1456_v2  ;;  %v1090_v6 = vmul.f32 %v1741_v4, %v1455_v3 }
 0x5fd   :  { %v1093_v10 = vmul.f32 %v1091_v5, %v1083_v57  ;;  %v1105_v11 = vrot.slane %v1091_v5, %v1948_v63  ;;  %v1092_v12 = vmul.f32 %v1090_v6, %v1083_v57  ;;  %v1101_v13 = vrot.slane %v1090_v6, %v1948_v63 }
 0x5ff   :  { %v1095_v14 = vsub.f32 %v1458_v8, %v1093_v10  ;;  %v1109_v15 = vmul.f32 %v1105_v11, %v1058_v43  ;;  %v1094_v16 = vsub.f32 %v1457_v9, %v1092_v12  ;;  %v1108_v17 = vmul.f32 %v1101_v13, %v1055_v38 }
 0x601   :  { %v1119_v18 = vrot.slane %v1095_v14, %v1948_v63  ;;  %v1115_v19 = vrot.slane %v1094_v16, %v1948_v63  ;;  %v1486_v14 = vld [vmem:[%s2254_s13] ss:$0 sm:$0xff]  ;;  %s1766_s13 = scalar_lea.vmem %s1362_s18, 32 }
 0x602   :  { %p1767_p8 = scmp.ne.s32.totalorder %s1362_s18, %s1766_s13  ;;  %p1772_p10 = scmp.lt.s32.totalorder %s1766_s13, %s1766_s13 }
 0x603   :  { %v1123_v20 = vadd.f32 %v1119_v18, %v1109_v15  ;;  %v1122_v21 = vadd.f32 %v1115_v19, %v1108_v17  ;;  %v1487_v19 = vld [vmem:[#allocation2] ss:$0 sm:$0xff] }
 0x604   :  { %p1773_p11 = por %p1772_p10, %p1771_p9 }
 0x605   :  { %v1125_v22 = vmax.f32 %v1123_v20, 0.0  ;;  %v1124_v23 = vmax.f32 %v1122_v21, 0.0  ;;  %v1341_v20 = vand.u32 127, %v165_v59 }
 0x606   :  { %p1774_p12 = pnand %p1773_p11, %p1767_p8 }
 0x607   :  { %v1493_v24 = vpack.c.bf16 %v1125_v22, %v1124_v23  ;;  %v1344_v22 = vsub.s32 %v1341_v20, %v1939_v60 }
 0x609   :  { %1665 = vmatmul.mubr.bf16.vlgmr.msra.gmra.mrb[8].mxu1 %v1493_v24 }
 0x6dc   :  { %v1241_v26 = vpop.f32.mrb[8].mxu1 }
 0x6dd   :  { %v1242_v27 = vadd.f32 %v1476_v25, %v1241_v26  ;;  %v1666_v28 = vpop.f32.mrb[9].mxu1 }
 0x6de   :  { %v1244_v29 = vpop.f32.mrb[10].mxu1 }
 0x6df   :  { %v1248_v30 = vadd.f32 %v1242_v27, %v2124_v41  ;;  %v1245_v31 = vadd.f32 %v1476_v25, %v1244_v29  ;;  %v1667_v32 = vpop.f32.mrb[11].mxu1 }
 0x6e1   :  { %v1249_v33 = vadd.f32 %v1245_v31, %v2127_v44  ;;  %v1261_v34 = vmul.f32 %v1248_v30, %v1248_v30 }
 0x6e3   :  { %v1254_v38 = vadd.f32 %v1249_v33, %v1248_v30  ;;  %v1262_v39 = vmul.f32 %v1249_v33, %v1249_v33 }
 0x6e5   :  { %v1255_v42 = vrot.slane %v1254_v38, 4  ;;  %v1263_v43 = vadd.f32 %v1262_v39, %v1261_v34 }
 0x6e7   :  { %v1256_v45 = vadd.f32 %v1255_v42, %v1254_v38  ;;  %v1264_v46 = vrot.slane %v1263_v43, 4 }
 0x6e9   :  { %v1257_v47 = vrot.slane %v1256_v45, 2  ;;  %v1265_v36 = vadd.f32 %v1264_v46, %v1263_v43 }
 0x6eb   :  { %v1258_v48 = vadd.f32 %v1257_v47, %v1256_v45  ;;  %v1266_v7 = vrot.slane %v1265_v36, 2 }
 0x6ed   :  { %v1259_v49 = vrot.slane %v1258_v48, 1  ;;  %v1267_v50 = vadd.f32 %v1266_v7, %v1265_v36 }
 0x6ef   :  { %v1260_v37 = vadd.f32 %v1259_v49, %v1258_v48  ;;  %v1268_v51 = vrot.slane %v1267_v50, 1 }
 0x6f1   :  { %v1269_v41 = vadd.f32 %v1268_v51, %v1267_v50  ;;  %v1270_v35 = vmul.f32 0.0625, %v1260_v37 }
 0x6f3   :  { %v1271_v52 = vmul.f32 0.0625, %v1269_v41  ;;  %v1272_v53 = vmul.f32 %v1270_v35, %v1270_v35 }
 0x6f5   :  { %v1273_v44 = vsub.f32 %v1271_v52, %v1272_v53 }
 0x6f7   :  { %v1274_v40 = vmax.f32 %v1273_v44, 0.0 }
 0x6f9   :  { %v1275_v54 = vadd.f32 1e-05, %v1274_v40 }
 0x6fb   :  { %1742 = vrsqrt.f32 %v1275_v54 }
 0x705   :  { %v1743_v57 = vpop.eup %1742 }
 0x706   :  { %v1278_v58 = vmul.f32 %v1743_v57, %v1251_v55  ;;  %v1277_v61 = vmul.f32 %v1743_v57, %v1250_v56 }
 0x708   :  { %v1280_v1 = vmul.f32 %v1278_v58, %v1270_v35  ;;  %v1292_v2 = vrot.slane %v1278_v58, %v1948_v63  ;;  %v1279_v3 = vmul.f32 %v1277_v61, %v1270_v35  ;;  %v1288_v4 = vrot.slane %v1277_v61, %v1948_v63 }
 0x70a   :  { %v1282_v5 = vsub.f32 %v1253_v62, %v1280_v1  ;;  %v1296_v6 = vmul.f32 %v1292_v2, %v1249_v33  ;;  %v1281_v8 = vsub.f32 %v1252_v0, %v1279_v3  ;;  %v1295_v9 = vmul.f32 %v1288_v4, %v1248_v30 }
 0x70c   :  { %v1306_v10 = vrot.slane %v1282_v5, %v1948_v63  ;;  %v1302_v11 = vrot.slane %v1281_v8, %v1948_v63 }
 0x70e   :  { %v1310_v12 = vadd.f32 %v1306_v10, %v1296_v6  ;;  %v1309_v13 = vadd.f32 %v1302_v11, %v1295_v9 }
 0x710   :  { %v1312_v15 = vmax.f32 %v1310_v12, 0.0  ;;  %v1311_v16 = vmax.f32 %v1309_v13, 0.0 }
 0x712   :  { %v1321_v17 = vmul.f32 %v1486_v14, %v1312_v15  ;;  %v1320_v18 = vmul.f32 %v1486_v14, %v1311_v16 }
 0x714   :  { %1324 = vadd.xlane.f32.xlu0 %v1321_v17  ;;  %1322 = vadd.xlane.f32.xlu1 %v1320_v18 }
 0x72a   :  { %1333 = vperm.xlu0 %1681, %v1487_v19  }
 0x7a1   :  { %v1325_v21 = vpop.xlane.xlu0 %1324  ;;  %v1323_v63 = vpop.xlane.xlu1 %1322 }
 0x7a9   :  { %v1334_v23 = vpop.permute.xlu0 %1333 }
 0x7aa   :  { %v1336_v24 = vadd.f32 %v1334_v23, %v1323_v63  ;;  %v1337_v25 = vadd.f32 %v1334_v23, %v1325_v21 }
 0x7ac   :  { %v1345_v26 = vrot.slane %v1336_v24, %v1344_v22  ;;  %v1349_v27 = vrot.slane %v1337_v25, %v1344_v22 }
 0x7ae   :  { %v1351_v28 = vsel %vm1350_vm1, %v1349_v27, %v1345_v26 }
 0x7af   :  { %1354 = vst.msk [vmem:[#allocation6] sm:$0x3] %vm1353_vm2, %v1351_v28 }
 0x7b0   :  { %1777 = shalt.err (!%p1774_p12)
}
 0x7b1   :  { %s1778_s22 = scalar_lea.hbm %s2256_s15, 32 }
 0x7b2   :  { %p1779_p13 = scmp.ne.s32.totalorder %s2256_s15, %s1778_s22  ;;  %p1782_p0 = scmp.lt.u32.totalorder %s1778_s22, %s2256_s15 }
 0x7b4   :  { %p1784_p1 = pnand %p1782_p0, %p1779_p13 }
 0x7b6   :  { %1787 = shalt.err (!%p1784_p1)
}
 0x7b7   :  { %1364 = dma.vmem_to_hbm [thread:$0]  %s1362_s18, 32, %s2256_s15, [#allocation5]  }
 0x7b8   :  { %1790 = dma.done.wait [#allocation5], 32  }
 0x7b9   :  { %1791 = vsyncadd [#allocation5], 4294967264 }
 0x7ba   :  { %1368 = vsyncpa [#allocation4], 1 }
 0x7bb   :  { %1369 = vsyncpa [#allocation5], 1 }

</bundles_post_ra>
